<compile_context>
chip_gen: v6e
topology: v6e:2x2x1
jax: 0.10.0
libtpu: 0.0.40
codegen_flags: <defaults>
</compile_context>

<pallas_src>
import functools

import numpy as np

import jax
import jax.numpy as jnp
from jax import lax
from jax.experimental import pallas as pl
from jax.experimental.pallas import tpu as pltpu


# ---------------------------------------------------------------------------
# Fused DecoderLayer kernel (one batch element per grid step)
# ---------------------------------------------------------------------------
def _decoder_layer_kernel(xp_ref, mp_ref, w1_ref, b1_ref, e1_ref,
                          w2_ref, b2_ref, e2_ref,
                          out1_ref, m1_ref, out2_ref, m2_ref,
                          comb2_scr,
                          *, H, W, C1, C2, neg_slope, win_size):
    """xp_ref/mp_ref: (1, H+2, W*C0) row-padded, lane-packed image / mask.
    w*_ref: (3, 2*W*Cin, W*Cout + W) banded weights (conv cols + mask cols).
    b*_ref: (1, W*Cout) per-lane (tiled) bias.  e*_ref: (W, W*Cout) expander.
    Outputs: conv slabs (1, H, W*Cout) and single-channel masks (1, H, W).
    """
    # ---------------- stage 1: Partial_Conv(2F -> F) + LeakyReLU -----------
    xp = xp_ref[0]                                     # (H+2, W*C0)
    mp = mp_ref[0]
    comb1 = jnp.concatenate([xp * mp, mp], axis=-1)    # (H+2, 2*W*C0)

    n1 = W * C1
    acc1 = jnp.zeros((H, n1 + W), jnp.float32)
    for kh in range(3):                                # statically unrolled
        acc1 = acc1 + jnp.dot(comb1[kh:kh + H, :], w1_ref[kh],
                              preferred_element_type=jnp.float32)

    conv1 = acc1[:, :n1]                               # image conv (no bias)
    msum1 = acc1[:, n1:]                               # all-ones mask conv (H, W)
    ratio1 = win_size / (msum1 + 1e-8)
    omc1 = jnp.clip(msum1, 0.0, 1.0)                   # mask_out_1 (1 channel)
    scale1 = jnp.dot(ratio1 * omc1, e1_ref[...],
                     preferred_element_type=jnp.float32)          # (H, W*C1)
    o1 = (conv1 + b1_ref[...]) * scale1                # bias pre-renorm (ref!)
    act1 = jnp.where(o1 >= 0.0, o1, neg_slope * o1)    # LeakyReLU(0.2)

    out1_ref[0] = act1
    m1_ref[0] = omc1

    # ---------------- stage 2: Partial_Conv(F -> F_out) + LeakyReLU --------
    # mask_out_1 has C1 identical channels == omc1; expand to packed layout.
    omc1e = jnp.dot(omc1, e1_ref[...], preferred_element_type=jnp.float32)
    core2 = jnp.concatenate([act1 * omc1e, omc1e], axis=-1)        # (H, 2*W*C1)

    # Row-padded stage-2 input lives in VMEM scratch (never touches HBM).
    comb2_scr[...] = jnp.zeros_like(comb2_scr)
    comb2_scr[1:H + 1, :] = core2

    n2 = W * C2
    acc2 = jnp.zeros((H, n2 + W), jnp.float32)
    for kh in range(3):
        acc2 = acc2 + jnp.dot(comb2_scr[kh:kh + H, :], w2_ref[kh],
                              preferred_element_type=jnp.float32)

    conv2 = acc2[:, :n2]
    msum2 = acc2[:, n2:]
    ratio2 = win_size / (msum2 + 1e-8)
    omc2 = jnp.clip(msum2, 0.0, 1.0)
    scale2 = jnp.dot(ratio2 * omc2, e2_ref[...],
                     preferred_element_type=jnp.float32)
    o2 = (conv2 + b2_ref[...]) * scale2
    act2 = jnp.where(o2 >= 0.0, o2, neg_slope * o2)

    out2_ref[0] = act2
    m2_ref[0] = omc2


# ---------------------------------------------------------------------------
# Banded-weight / helper constant construction (plain JAX, tiny arrays)
# ---------------------------------------------------------------------------
def _banded_weights(w_hwio, width):
    """Banded weight for one Partial_Conv stage.

    Shape (3, 2*width*Cin, width*Cout + width).  Rows [0, W*Cin) act on the
    packed (x*m) region, rows [W*Cin, 2*W*Cin) on the packed mask region.
    Columns [0, W*Cout) produce the image conv, columns [W*Cout, W*Cout+W)
    produce the all-ones mask conv.  Column ('same') zero-padding of the 3x3
    conv is encoded in the band: input pixel p feeds output pixel w iff
    p == w + kw - 1.
    """
    kh_, kw_, cin, cout = w_hwio.shape
    assert (kh_, kw_) == (3, 3)
    w_hwio = w_hwio.astype(jnp.float32)
    per_kh = []
    for kh in range(3):
        img_blk = jnp.zeros((width * cin, width * cout), jnp.float32)
        msk_blk = jnp.zeros((width * cin, width), jnp.float32)
        for kw in range(3):
            sel = jnp.eye(width, width, k=1 - kw, dtype=jnp.float32)
            img_blk = img_blk + jnp.kron(sel, w_hwio[kh, kw])
            msk_blk = msk_blk + jnp.kron(sel, jnp.ones((cin, 1), jnp.float32))
        top = jnp.concatenate(
            [img_blk, jnp.zeros((width * cin, width), jnp.float32)], axis=1)
        bot = jnp.concatenate(
            [jnp.zeros((width * cin, width * cout), jnp.float32), msk_blk],
            axis=1)
        per_kh.append(jnp.concatenate([top, bot], axis=0))
    return jnp.stack(per_kh, axis=0)


def _expander(width, channels):
    """(W, W*C) matrix that broadcasts a per-pixel value across its C packed
    lanes via a (slack) MXU matmul inside the kernel."""
    return jnp.kron(jnp.eye(width, dtype=jnp.float32),
                    jnp.ones((1, channels), jnp.float32))


# ---------------------------------------------------------------------------
# Public wrapper: DecoderLayer.forward (NCHW in / NCHW out, PyTorch layout)
# ---------------------------------------------------------------------------
def decoder_layer(input_image, input_mask, shared_image, shared_mask, params):
    n, f, hs, ws = input_image.shape
    H, W = 2 * hs, 2 * ws
    w1, b1 = params["w1"], params["b1"]
    w2, b2 = params["w2"], params["b2"]
    C0 = w1.shape[2]          # 2 * in_filters
    C1 = w1.shape[3]          # in_filters
    C2 = w2.shape[3]          # out_filters

    to_nhwc = lambda t: jnp.transpose(t, (0, 2, 3, 1))
    x, m = to_nhwc(input_image), to_nhwc(input_mask)
    sx, sm = to_nhwc(shared_image), to_nhwc(shared_mask)

    # nn.Upsample(scale=(2,2), mode='nearest') + torch.cat(axis=1) : XLA glue.
    up = lambda t: jnp.repeat(jnp.repeat(t, 2, axis=1), 2, axis=2)
    cat_x = jnp.concatenate([sx, up(x)], axis=-1)          # (N, H, W, C0)
    cat_m = jnp.concatenate([sm, up(m)], axis=-1)

    # Row-pad only (column padding lives inside the banded weights) and pack
    # lane-dense: (N, H+2, W*C0).  W*C0 == 128 at the default sizes.
    pack = lambda t: jnp.pad(t.astype(jnp.float32),
                             ((0, 0), (1, 1), (0, 0), (0, 0))
                             ).reshape(n, H + 2, W * C0)
    xp, mp = pack(cat_x), pack(cat_m)

    w1b = _banded_weights(w1, W)                     # (3, 2*W*C0, W*C1 + W)
    w2b = _banded_weights(w2, W)                     # (3, 2*W*C1, W*C2 + W)
    b1t = jnp.tile(b1.astype(jnp.float32), W).reshape(1, W * C1)
    b2t = jnp.tile(b2.astype(jnp.float32), W).reshape(1, W * C2)
    e1 = _expander(W, C1)
    e2 = _expander(W, C2)

    kernel = functools.partial(_decoder_layer_kernel, H=H, W=W, C1=C1, C2=C2,
                               neg_slope=0.2, win_size=9.0)

    out1, m1, out2, m2 = pl.pallas_call(
        kernel,
        grid=(n,),
        in_specs=[
            pl.BlockSpec((1, H + 2, W * C0), lambda i: (i, 0, 0)),
            pl.BlockSpec((1, H + 2, W * C0), lambda i: (i, 0, 0)),
            pl.BlockSpec((3, 2 * W * C0, W * C1 + W), lambda i: (0, 0, 0)),
            pl.BlockSpec((1, W * C1), lambda i: (0, 0)),
            pl.BlockSpec((W, W * C1), lambda i: (0, 0)),
            pl.BlockSpec((3, 2 * W * C1, W * C2 + W), lambda i: (0, 0, 0)),
            pl.BlockSpec((1, W * C2), lambda i: (0, 0)),
            pl.BlockSpec((W, W * C2), lambda i: (0, 0)),
        ],
        out_specs=[
            pl.BlockSpec((1, H, W * C1), lambda i: (i, 0, 0)),
            pl.BlockSpec((1, H, W), lambda i: (i, 0, 0)),
            pl.BlockSpec((1, H, W * C2), lambda i: (i, 0, 0)),
            pl.BlockSpec((1, H, W), lambda i: (i, 0, 0)),
        ],
        out_shape=[
            jax.ShapeDtypeStruct((n, H, W * C1), jnp.float32),
            jax.ShapeDtypeStruct((n, H, W), jnp.float32),
            jax.ShapeDtypeStruct((n, H, W * C2), jnp.float32),
            jax.ShapeDtypeStruct((n, H, W), jnp.float32),
        ],
        scratch_shapes=[pltpu.VMEM((H + 2, 2 * W * C1), jnp.float32)],
        compiler_params=pltpu.CompilerParams(
            dimension_semantics=("parallel",)),
    )(xp, mp, w1b, b1t, e1, w2b, b2t, e2)

    # Unpack lane-dense kernel outputs back to PyTorch's NCHW convention.
    to_nchw = lambda t: jnp.transpose(t, (0, 3, 1, 2))
    conv_out_1 = to_nchw(out1.reshape(n, H, W, C1))
    conv_out_2 = to_nchw(out2.reshape(n, H, W, C2))
    # The all-ones mask conv makes every output channel identical: broadcast
    # the single-channel kernel mask lazily (saves Cout x HBM traffic).
    mask_out_1 = jnp.broadcast_to(m1[:, None, :, :], (n, C1, H, W))
    mask_out_2 = jnp.broadcast_to(m2[:, None, :, :], (n, C2, H, W))
    return conv_out_1, mask_out_1, conv_out_2, mask_out_2


# ---------------------------------------------------------------------------
# Parameters + pure-JAX reference (for a correctness check)
# ---------------------------------------------------------------------------
def init_decoder_params(key, in_filters, out_filters):
    k1, k2, k3, k4 = jax.random.split(key, 4)
    w1 = 0.1 * jax.random.normal(k1, (3, 3, 2 * in_filters, in_filters),
                                 jnp.float32)
    b1 = 0.1 * jax.random.normal(k2, (in_filters,), jnp.float32)
    w2 = 0.1 * jax.random.normal(k3, (3, 3, in_filters, out_filters),
                                 jnp.float32)
    b2 = 0.1 * jax.random.normal(k4, (out_filters,), jnp.float32)
    return {"w1": w1, "b1": b1, "w2": w2, "b2": b2}


def _partial_conv_ref(x, m, w, b, win=9.0):
    dn = ("NHWC", "HWIO", "NHWC")
    prec = lax.Precision.HIGHEST
    conv = lax.conv_general_dilated(x * m, w, (1, 1), ((1, 1), (1, 1)),
                                    dimension_numbers=dn, precision=prec) + b
    msum = lax.conv_general_dilated(m, jnp.ones_like(w), (1, 1),
                                    ((1, 1), (1, 1)),
                                    dimension_numbers=dn, precision=prec)
    ratio = win / (msum + 1e-8)
    mclamp = jnp.clip(msum, 0.0, 1.0)
    return conv * (ratio * mclamp), mclamp


def _decoder_layer_ref(input_image, input_mask, shared_image, shared_mask,
                       params):
    to_nhwc = lambda t: jnp.transpose(t, (0, 2, 3, 1))
    to_nchw = lambda t: jnp.transpose(t, (0, 3, 1, 2))
    lrelu = lambda t: jnp.where(t >= 0.0, t, 0.2 * t)
    up = lambda t: jnp.repeat(jnp.repeat(t, 2, axis=1), 2, axis=2)
    x, m = to_nhwc(input_image), to_nhwc(input_mask)
    sx, sm = to_nhwc(shared_image), to_nhwc(shared_mask)
    cx = jnp.concatenate([sx, up(x)], axis=-1)
    cm = jnp.concatenate([sm, up(m)], axis=-1)
    o1, k1 = _partial_conv_ref(cx, cm, params["w1"], params["b1"])
    o1 = lrelu(o1)
    o2, k2 = _partial_conv_ref(o1, k1, params["w2"], params["b2"])
    o2 = lrelu(o2)
    return to_nchw(o1), to_nchw(k1), to_nchw(o2), to_nchw(k2)


if __name__ == "__main__":
    key = jax.random.PRNGKey(0)
    kp, k_img, k_msk, k_simg, k_smsk = jax.random.split(key, 5)

    N = 2
    in_filters = 4
    out_filters = 2
    Hs, Ws = 8, 8          # low-res input (upsampled to 16x16)

    params = init_decoder_params(kp, in_filters, out_filters)
    input_image = jax.random.normal(k_img, (N, in_filters, Hs, Ws),
                                    jnp.float32)
    input_mask = jax.random.bernoulli(
        k_msk, 0.7, (N, in_filters, Hs, Ws)).astype(jnp.float32)
    shared_image = jax.random.normal(k_simg,
                                     (N, in_filters, 2 * Hs, 2 * Ws),
                                     jnp.float32)
    shared_mask = jax.random.bernoulli(
        k_smsk, 0.7, (N, in_filters, 2 * Hs, 2 * Ws)).astype(jnp.float32)

    fn = jax.jit(decoder_layer)
    outs = jax.block_until_ready(
        fn(input_image, input_mask, shared_image, shared_mask, params))

    c1, m1, c2, m2 = outs
    assert c1.shape == (N, in_filters, 2 * Hs, 2 * Ws)
    assert m1.shape == (N, in_filters, 2 * Hs, 2 * Ws)
    assert c2.shape == (N, out_filters, 2 * Hs, 2 * Ws)
    assert m2.shape == (N, out_filters, 2 * Hs, 2 * Ws)

    refs = _decoder_layer_ref(input_image, input_mask, shared_image,
                              shared_mask, params)
    for got, want in zip(outs, refs):
        np.testing.assert_allclose(np.asarray(got), np.asarray(want),
                                   rtol=5e-2, atol=5e-2)

    print("KERNEL_OK")
</pallas_src>

<mosaic_0001>
module attributes {stable_mosaic.version = 11 : i64} {
  func.func @_decoder_layer_kernel(%arg0: i32, %arg1: memref<1x18x128xf32, #tpu.memory_space<vmem>>, %arg2: memref<1x18x128xf32, #tpu.memory_space<vmem>>, %arg3: memref<3x256x80xf32, #tpu.memory_space<vmem>>, %arg4: memref<1x64xf32, #tpu.memory_space<vmem>>, %arg5: memref<16x64xf32, #tpu.memory_space<vmem>>, %arg6: memref<3x128x48xf32, #tpu.memory_space<vmem>>, %arg7: memref<1x32xf32, #tpu.memory_space<vmem>>, %arg8: memref<16x32xf32, #tpu.memory_space<vmem>>, %arg9: memref<1x16x64xf32, #tpu.memory_space<vmem>>, %arg10: memref<1x16x16xf32, #tpu.memory_space<vmem>>, %arg11: memref<1x16x32xf32, #tpu.memory_space<vmem>>, %arg12: memref<1x16x16xf32, #tpu.memory_space<vmem>>, %arg13: memref<18x128xf32, #tpu.memory_space<vmem>>) attributes {dimension_semantics = [#tpu.dimension_semantics<parallel>], iteration_bounds = array<i64: 2>, scalar_prefetch = 0 : i64, scratch_operands = 1 : i64, tpu.core_type = #tpu.core_type<tc>, window_params = [{transform_indices = @transform_0, window_bounds = array<i64: 1, 18, 128>}, {transform_indices = @transform_1, window_bounds = array<i64: 1, 18, 128>}, {pipeline_mode = #tpu.pipeline_mode<synchronous>, transform_indices = @transform_2, window_bounds = array<i64: 3, 256, 80>}, {pipeline_mode = #tpu.pipeline_mode<synchronous>, transform_indices = @transform_3, window_bounds = array<i64: 1, 64>}, {pipeline_mode = #tpu.pipeline_mode<synchronous>, transform_indices = @transform_4, window_bounds = array<i64: 16, 64>}, {pipeline_mode = #tpu.pipeline_mode<synchronous>, transform_indices = @transform_5, window_bounds = array<i64: 3, 128, 48>}, {pipeline_mode = #tpu.pipeline_mode<synchronous>, transform_indices = @transform_6, window_bounds = array<i64: 1, 32>}, {pipeline_mode = #tpu.pipeline_mode<synchronous>, transform_indices = @transform_7, window_bounds = array<i64: 16, 32>}, {transform_indices = @transform_8, window_bounds = array<i64: 1, 16, 64>}, {transform_indices = @transform_9, window_bounds = array<i64: 1, 16, 16>}, {transform_indices = @transform_10, window_bounds = array<i64: 1, 16, 32>}, {transform_indices = @transform_11, window_bounds = array<i64: 1, 16, 16>}]} {
    %c0 = arith.constant 0 : index
    %c0_0 = arith.constant 0 : index
    %c0_1 = arith.constant 0 : index
    %0 = vector.load %arg1[%c0, %c0_0, %c0_1] : memref<1x18x128xf32, #tpu.memory_space<vmem>>, vector<1x18x128xf32>
    %1 = vector.shape_cast %0 : vector<1x18x128xf32> to vector<18x128xf32>
    %c0_2 = arith.constant 0 : index
    %c0_3 = arith.constant 0 : index
    %c0_4 = arith.constant 0 : index
    %2 = vector.load %arg2[%c0_2, %c0_3, %c0_4] : memref<1x18x128xf32, #tpu.memory_space<vmem>>, vector<1x18x128xf32>
    %3 = vector.shape_cast %2 : vector<1x18x128xf32> to vector<18x128xf32>
    %4 = arith.mulf %1, %3 : vector<18x128xf32>
    %5 = tpu.concatenate %4, %3 in 1 : vector<18x128xf32>, vector<18x128xf32> -> vector<18x256xf32>
    %cst = arith.constant 0.000000e+00 : f32
    %6 = vector.broadcast %cst : f32 to vector<16x80xf32>
    %7 = vector.extract_strided_slice %5 {offsets = [0, 0], sizes = [16, 256], strides = [1, 1]} : vector<18x256xf32> to vector<16x256xf32>
    %c0_5 = arith.constant 0 : index
    %c0_6 = arith.constant 0 : index
    %c0_7 = arith.constant 0 : index
    %8 = vector.load %arg3[%c0_5, %c0_6, %c0_7] : memref<3x256x80xf32, #tpu.memory_space<vmem>>, vector<1x256x80xf32>
    %9 = vector.shape_cast %8 : vector<1x256x80xf32> to vector<256x80xf32>
    %cst_8 = arith.constant dense<0.000000e+00> : vector<16x80xf32>
    %10 = tpu.matmul %7, %9, %cst_8 {dimension_numbers = #tpu.dot_dimension_numbers<[1], [0], [0], [1], [0, 0, 1, 1], [], []>} : vector<16x256xf32>, vector<256x80xf32>, vector<16x80xf32> -> vector<16x80xf32>
    %11 = arith.addf %6, %10 : vector<16x80xf32>
    %12 = vector.extract_strided_slice %5 {offsets = [1, 0], sizes = [16, 256], strides = [1, 1]} : vector<18x256xf32> to vector<16x256xf32>
    %c1 = arith.constant 1 : index
    %c0_9 = arith.constant 0 : index
    %c0_10 = arith.constant 0 : index
    %13 = vector.load %arg3[%c1, %c0_9, %c0_10] : memref<3x256x80xf32, #tpu.memory_space<vmem>>, vector<1x256x80xf32>
    %14 = vector.shape_cast %13 : vector<1x256x80xf32> to vector<256x80xf32>
    %cst_11 = arith.constant dense<0.000000e+00> : vector<16x80xf32>
    %15 = tpu.matmul %12, %14, %cst_11 {dimension_numbers = #tpu.dot_dimension_numbers<[1], [0], [0], [1], [0, 0, 1, 1], [], []>} : vector<16x256xf32>, vector<256x80xf32>, vector<16x80xf32> -> vector<16x80xf32>
    %16 = arith.addf %11, %15 : vector<16x80xf32>
    %17 = vector.extract_strided_slice %5 {offsets = [2, 0], sizes = [16, 256], strides = [1, 1]} : vector<18x256xf32> to vector<16x256xf32>
    %c2 = arith.constant 2 : index
    %c0_12 = arith.constant 0 : index
    %c0_13 = arith.constant 0 : index
    %18 = vector.load %arg3[%c2, %c0_12, %c0_13] : memref<3x256x80xf32, #tpu.memory_space<vmem>>, vector<1x256x80xf32>
    %19 = vector.shape_cast %18 : vector<1x256x80xf32> to vector<256x80xf32>
    %cst_14 = arith.constant dense<0.000000e+00> : vector<16x80xf32>
    %20 = tpu.matmul %17, %19, %cst_14 {dimension_numbers = #tpu.dot_dimension_numbers<[1], [0], [0], [1], [0, 0, 1, 1], [], []>} : vector<16x256xf32>, vector<256x80xf32>, vector<16x80xf32> -> vector<16x80xf32>
    %21 = arith.addf %16, %20 : vector<16x80xf32>
    %22 = vector.extract_strided_slice %21 {offsets = [0, 0], sizes = [16, 64], strides = [1, 1]} : vector<16x80xf32> to vector<16x64xf32>
    %23 = vector.extract_strided_slice %21 {offsets = [0, 64], sizes = [16, 16], strides = [1, 1]} : vector<16x80xf32> to vector<16x16xf32>
    %cst_15 = arith.constant 9.99999993E-9 : f32
    %24 = vector.broadcast %cst_15 : f32 to vector<16x16xf32>
    %25 = arith.addf %23, %24 : vector<16x16xf32>
    %cst_16 = arith.constant 9.000000e+00 : f32
    %26 = vector.broadcast %cst_16 : f32 to vector<16x16xf32>
    %27 = arith.divf %26, %25 : vector<16x16xf32>
    %cst_17 = arith.constant 0.000000e+00 : f32
    %cst_18 = arith.constant 1.000000e+00 : f32
    %28 = vector.broadcast %cst_17 : f32 to vector<16x16xf32>
    %29 = arith.maximumf %28, %23 : vector<16x16xf32>
    %30 = vector.broadcast %cst_18 : f32 to vector<16x16xf32>
    %31 = arith.minimumf %30, %29 : vector<16x16xf32>
    %32 = arith.mulf %27, %31 : vector<16x16xf32>
    %c0_19 = arith.constant 0 : index
    %c0_20 = arith.constant 0 : index
    %33 = vector.load %arg5[%c0_19, %c0_20] : memref<16x64xf32, #tpu.memory_space<vmem>>, vector<16x64xf32>
    %cst_21 = arith.constant dense<0.000000e+00> : vector<16x64xf32>
    %34 = tpu.matmul %32, %33, %cst_21 {dimension_numbers = #tpu.dot_dimension_numbers<[1], [0], [0], [1], [0, 0, 1, 1], [], []>} : vector<16x16xf32>, vector<16x64xf32>, vector<16x64xf32> -> vector<16x64xf32>
    %c0_22 = arith.constant 0 : index
    %c0_23 = arith.constant 0 : index
    %35 = vector.load %arg4[%c0_22, %c0_23] : memref<1x64xf32, #tpu.memory_space<vmem>>, vector<1x64xf32>
    %36 = vector.broadcast %35 : vector<1x64xf32> to vector<16x64xf32>
    %37 = arith.addf %22, %36 : vector<16x64xf32>
    %38 = arith.mulf %37, %34 : vector<16x64xf32>
    %cst_24 = arith.constant 0.000000e+00 : f32
    %39 = vector.broadcast %cst_24 : f32 to vector<16x64xf32>
    %40 = arith.cmpf oge, %38, %39 : vector<16x64xf32>
    %cst_25 = arith.constant 2.000000e-01 : f32
    %41 = vector.broadcast %cst_25 : f32 to vector<16x64xf32>
    %42 = arith.mulf %41, %38 : vector<16x64xf32>
    %43 = arith.select %40, %38, %42 : vector<16x64xi1>, vector<16x64xf32>
    %c0_26 = arith.constant 0 : index
    %c0_27 = arith.constant 0 : index
    %c0_28 = arith.constant 0 : index
    %44 = vector.load %arg9[%c0_26, %c0_27, %c0_28] : memref<1x16x64xf32, #tpu.memory_space<vmem>>, vector<1x16x64xf32>
    %45 = vector.shape_cast %44 : vector<1x16x64xf32> to vector<16x64xf32>
    %46 = vector.shape_cast %43 : vector<16x64xf32> to vector<1x16x64xf32>
    tpu.vector_store %arg9[%c0_26, %c0_27, %c0_28], %46 {strides = array<i32>} : memref<1x16x64xf32, #tpu.memory_space<vmem>>, vector<1x16x64xf32>,
    %c0_29 = arith.constant 0 : index
    %c0_30 = arith.constant 0 : index
    %c0_31 = arith.constant 0 : index
    %47 = vector.load %arg10[%c0_29, %c0_30, %c0_31] : memref<1x16x16xf32, #tpu.memory_space<vmem>>, vector<1x16x16xf32>
    %48 = vector.shape_cast %47 : vector<1x16x16xf32> to vector<16x16xf32>
    %49 = vector.shape_cast %31 : vector<16x16xf32> to vector<1x16x16xf32>
    tpu.vector_store %arg10[%c0_29, %c0_30, %c0_31], %49 {strides = array<i32>} : memref<1x16x16xf32, #tpu.memory_space<vmem>>, vector<1x16x16xf32>,
    %c0_32 = arith.constant 0 : index
    %c0_33 = arith.constant 0 : index
    %50 = vector.load %arg5[%c0_32, %c0_33] : memref<16x64xf32, #tpu.memory_space<vmem>>, vector<16x64xf32>
    %cst_34 = arith.constant dense<0.000000e+00> : vector<16x64xf32>
    %51 = tpu.matmul %31, %50, %cst_34 {dimension_numbers = #tpu.dot_dimension_numbers<[1], [0], [0], [1], [0, 0, 1, 1], [], []>} : vector<16x16xf32>, vector<16x64xf32>, vector<16x64xf32> -> vector<16x64xf32>
    %52 = arith.mulf %43, %51 : vector<16x64xf32>
    %53 = tpu.concatenate %52, %51 in 1 : vector<16x64xf32>, vector<16x64xf32> -> vector<16x128xf32>
    %cst_35 = arith.constant 0.000000e+00 : f32
    %54 = vector.broadcast %cst_35 : f32 to vector<18x128xf32>
    %c0_36 = arith.constant 0 : index
    %c0_37 = arith.constant 0 : index
    %55 = vector.load %arg13[%c0_36, %c0_37] : memref<18x128xf32, #tpu.memory_space<vmem>>, vector<18x128xf32>
    tpu.vector_store %arg13[%c0_36, %c0_37], %54 {strides = array<i32>} : memref<18x128xf32, #tpu.memory_space<vmem>>, vector<18x128xf32>,
    %c1_38 = arith.constant 1 : index
    %c0_39 = arith.constant 0 : index
    %56 = vector.load %arg13[%c1_38, %c0_39] : memref<18x128xf32, #tpu.memory_space<vmem>>, vector<16x128xf32>
    tpu.vector_store %arg13[%c1_38, %c0_39], %53 {strides = array<i32>} : memref<18x128xf32, #tpu.memory_space<vmem>>, vector<16x128xf32>,
    %cst_40 = arith.constant 0.000000e+00 : f32
    %57 = vector.broadcast %cst_40 : f32 to vector<16x48xf32>
    %c0_41 = arith.constant 0 : index
    %c0_42 = arith.constant 0 : index
    %58 = vector.load %arg13[%c0_41, %c0_42] : memref<18x128xf32, #tpu.memory_space<vmem>>, vector<16x128xf32>
    %c0_43 = arith.constant 0 : index
    %c0_44 = arith.constant 0 : index
    %c0_45 = arith.constant 0 : index
    %59 = vector.load %arg6[%c0_43, %c0_44, %c0_45] : memref<3x128x48xf32, #tpu.memory_space<vmem>>, vector<1x128x48xf32>
    %60 = vector.shape_cast %59 : vector<1x128x48xf32> to vector<128x48xf32>
    %cst_46 = arith.constant dense<0.000000e+00> : vector<16x48xf32>
    %61 = tpu.matmul %58, %60, %cst_46 {dimension_numbers = #tpu.dot_dimension_numbers<[1], [0], [0], [1], [0, 0, 1, 1], [], []>} : vector<16x128xf32>, vector<128x48xf32>, vector<16x48xf32> -> vector<16x48xf32>
    %62 = arith.addf %57, %61 : vector<16x48xf32>
    %c1_47 = arith.constant 1 : index
    %c0_48 = arith.constant 0 : index
    %63 = vector.load %arg13[%c1_47, %c0_48] : memref<18x128xf32, #tpu.memory_space<vmem>>, vector<16x128xf32>
    %c1_49 = arith.constant 1 : index
    %c0_50 = arith.constant 0 : index
    %c0_51 = arith.constant 0 : index
    %64 = vector.load %arg6[%c1_49, %c0_50, %c0_51] : memref<3x128x48xf32, #tpu.memory_space<vmem>>, vector<1x128x48xf32>
    %65 = vector.shape_cast %64 : vector<1x128x48xf32> to vector<128x48xf32>
    %cst_52 = arith.constant dense<0.000000e+00> : vector<16x48xf32>
    %66 = tpu.matmul %63, %65, %cst_52 {dimension_numbers = #tpu.dot_dimension_numbers<[1], [0], [0], [1], [0, 0, 1, 1], [], []>} : vector<16x128xf32>, vector<128x48xf32>, vector<16x48xf32> -> vector<16x48xf32>
    %67 = arith.addf %62, %66 : vector<16x48xf32>
    %c2_53 = arith.constant 2 : index
    %c0_54 = arith.constant 0 : index
    %68 = vector.load %arg13[%c2_53, %c0_54] : memref<18x128xf32, #tpu.memory_space<vmem>>, vector<16x128xf32>
    %c2_55 = arith.constant 2 : index
    %c0_56 = arith.constant 0 : index
    %c0_57 = arith.constant 0 : index
    %69 = vector.load %arg6[%c2_55, %c0_56, %c0_57] : memref<3x128x48xf32, #tpu.memory_space<vmem>>, vector<1x128x48xf32>
    %70 = vector.shape_cast %69 : vector<1x128x48xf32> to vector<128x48xf32>
    %cst_58 = arith.constant dense<0.000000e+00> : vector<16x48xf32>
    %71 = tpu.matmul %68, %70, %cst_58 {dimension_numbers = #tpu.dot_dimension_numbers<[1], [0], [0], [1], [0, 0, 1, 1], [], []>} : vector<16x128xf32>, vector<128x48xf32>, vector<16x48xf32> -> vector<16x48xf32>
    %72 = arith.addf %67, %71 : vector<16x48xf32>
    %73 = vector.extract_strided_slice %72 {offsets = [0, 0], sizes = [16, 32], strides = [1, 1]} : vector<16x48xf32> to vector<16x32xf32>
    %74 = vector.extract_strided_slice %72 {offsets = [0, 32], sizes = [16, 16], strides = [1, 1]} : vector<16x48xf32> to vector<16x16xf32>
    %cst_59 = arith.constant 9.99999993E-9 : f32
    %75 = vector.broadcast %cst_59 : f32 to vector<16x16xf32>
    %76 = arith.addf %74, %75 : vector<16x16xf32>
    %cst_60 = arith.constant 9.000000e+00 : f32
    %77 = vector.broadcast %cst_60 : f32 to vector<16x16xf32>
    %78 = arith.divf %77, %76 : vector<16x16xf32>
    %cst_61 = arith.constant 0.000000e+00 : f32
    %cst_62 = arith.constant 1.000000e+00 : f32
    %79 = vector.broadcast %cst_61 : f32 to vector<16x16xf32>
    %80 = arith.maximumf %79, %74 : vector<16x16xf32>
    %81 = vector.broadcast %cst_62 : f32 to vector<16x16xf32>
    %82 = arith.minimumf %81, %80 : vector<16x16xf32>
    %83 = arith.mulf %78, %82 : vector<16x16xf32>
    %c0_63 = arith.constant 0 : index
    %c0_64 = arith.constant 0 : index
    %84 = vector.load %arg8[%c0_63, %c0_64] : memref<16x32xf32, #tpu.memory_space<vmem>>, vector<16x32xf32>
    %cst_65 = arith.constant dense<0.000000e+00> : vector<16x32xf32>
    %85 = tpu.matmul %83, %84, %cst_65 {dimension_numbers = #tpu.dot_dimension_numbers<[1], [0], [0], [1], [0, 0, 1, 1], [], []>} : vector<16x16xf32>, vector<16x32xf32>, vector<16x32xf32> -> vector<16x32xf32>
    %c0_66 = arith.constant 0 : index
    %c0_67 = arith.constant 0 : index
    %86 = vector.load %arg7[%c0_66, %c0_67] : memref<1x32xf32, #tpu.memory_space<vmem>>, vector<1x32xf32>
    %87 = vector.broadcast %86 : vector<1x32xf32> to vector<16x32xf32>
    %88 = arith.addf %73, %87 : vector<16x32xf32>
    %89 = arith.mulf %88, %85 : vector<16x32xf32>
    %cst_68 = arith.constant 0.000000e+00 : f32
    %90 = vector.broadcast %cst_68 : f32 to vector<16x32xf32>
    %91 = arith.cmpf oge, %89, %90 : vector<16x32xf32>
    %cst_69 = arith.constant 2.000000e-01 : f32
    %92 = vector.broadcast %cst_69 : f32 to vector<16x32xf32>
    %93 = arith.mulf %92, %89 : vector<16x32xf32>
    %94 = arith.select %91, %89, %93 : vector<16x32xi1>, vector<16x32xf32>
    %c0_70 = arith.constant 0 : index
    %c0_71 = arith.constant 0 : index
    %c0_72 = arith.constant 0 : index
    %95 = vector.load %arg11[%c0_70, %c0_71, %c0_72] : memref<1x16x32xf32, #tpu.memory_space<vmem>>, vector<1x16x32xf32>
    %96 = vector.shape_cast %95 : vector<1x16x32xf32> to vector<16x32xf32>
    %97 = vector.shape_cast %94 : vector<16x32xf32> to vector<1x16x32xf32>
    tpu.vector_store %arg11[%c0_70, %c0_71, %c0_72], %97 {strides = array<i32>} : memref<1x16x32xf32, #tpu.memory_space<vmem>>, vector<1x16x32xf32>,
    %c0_73 = arith.constant 0 : index
    %c0_74 = arith.constant 0 : index
    %c0_75 = arith.constant 0 : index
    %98 = vector.load %arg12[%c0_73, %c0_74, %c0_75] : memref<1x16x16xf32, #tpu.memory_space<vmem>>, vector<1x16x16xf32>
    %99 = vector.shape_cast %98 : vector<1x16x16xf32> to vector<16x16xf32>
    %100 = vector.shape_cast %82 : vector<16x16xf32> to vector<1x16x16xf32>
    tpu.vector_store %arg12[%c0_73, %c0_74, %c0_75], %100 {strides = array<i32>} : memref<1x16x16xf32, #tpu.memory_space<vmem>>, vector<1x16x16xf32>,
    return
  }
  func.func @transform_0(%arg0: i32) -> (i32, i32, i32) {
    %c0_i32 = arith.constant 0 : i32
    %c0_i32_0 = arith.constant 0 : i32
    %c0_i32_1 = arith.constant 0 : i32
    return %arg0, %c0_i32, %c0_i32_0 : i32, i32, i32
  }
  func.func @transform_1(%arg0: i32) -> (i32, i32, i32) {
    %c0_i32 = arith.constant 0 : i32
    %c0_i32_0 = arith.constant 0 : i32
    %c0_i32_1 = arith.constant 0 : i32
    return %arg0, %c0_i32, %c0_i32_0 : i32, i32, i32
  }
  func.func @transform_2(%arg0: i32) -> (i32, i32, i32) {
    %c0_i32 = arith.constant 0 : i32
    %c0_i32_0 = arith.constant 0 : i32
    %c0_i32_1 = arith.constant 0 : i32
    %c0_i32_2 = arith.constant 0 : i32
    return %c0_i32, %c0_i32_0, %c0_i32_1 : i32, i32, i32
  }
  func.func @transform_3(%arg0: i32) -> (i32, i32) {
    %c0_i32 = arith.constant 0 : i32
    %c0_i32_0 = arith.constant 0 : i32
    %c0_i32_1 = arith.constant 0 : i32
    return %c0_i32, %c0_i32_0 : i32, i32
  }
  func.func @transform_4(%arg0: i32) -> (i32, i32) {
    %c0_i32 = arith.constant 0 : i32
    %c0_i32_0 = arith.constant 0 : i32
    %c0_i32_1 = arith.constant 0 : i32
    return %c0_i32, %c0_i32_0 : i32, i32
  }
  func.func @transform_5(%arg0: i32) -> (i32, i32, i32) {
    %c0_i32 = arith.constant 0 : i32
    %c0_i32_0 = arith.constant 0 : i32
    %c0_i32_1 = arith.constant 0 : i32
    %c0_i32_2 = arith.constant 0 : i32
    return %c0_i32, %c0_i32_0, %c0_i32_1 : i32, i32, i32
  }
  func.func @transform_6(%arg0: i32) -> (i32, i32) {
    %c0_i32 = arith.constant 0 : i32
    %c0_i32_0 = arith.constant 0 : i32
    %c0_i32_1 = arith.constant 0 : i32
    return %c0_i32, %c0_i32_0 : i32, i32
  }
  func.func @transform_7(%arg0: i32) -> (i32, i32) {
    %c0_i32 = arith.constant 0 : i32
    %c0_i32_0 = arith.constant 0 : i32
    %c0_i32_1 = arith.constant 0 : i32
    return %c0_i32, %c0_i32_0 : i32, i32
  }
  func.func @transform_8(%arg0: i32) -> (i32, i32, i32) {
    %c0_i32 = arith.constant 0 : i32
    %c0_i32_0 = arith.constant 0 : i32
    %c0_i32_1 = arith.constant 0 : i32
    return %arg0, %c0_i32, %c0_i32_0 : i32, i32, i32
  }
  func.func @transform_9(%arg0: i32) -> (i32, i32, i32) {
    %c0_i32 = arith.constant 0 : i32
    %c0_i32_0 = arith.constant 0 : i32
    %c0_i32_1 = arith.constant 0 : i32
    return %arg0, %c0_i32, %c0_i32_0 : i32, i32, i32
  }
  func.func @transform_10(%arg0: i32) -> (i32, i32, i32) {
    %c0_i32 = arith.constant 0 : i32
    %c0_i32_0 = arith.constant 0 : i32
    %c0_i32_1 = arith.constant 0 : i32
    return %arg0, %c0_i32, %c0_i32_0 : i32, i32, i32
  }
  func.func @transform_11(%arg0: i32) -> (i32, i32, i32) {
    %c0_i32 = arith.constant 0 : i32
    %c0_i32_0 = arith.constant 0 : i32
    %c0_i32_1 = arith.constant 0 : i32
    return %arg0, %c0_i32, %c0_i32_0 : i32, i32, i32
  }
}

</mosaic_0001>

<bundles_post_ra>
// kernel: tile.13
= control target key start
LH: loop header
LB: loop body
LE: loop exit
PB: predicated region body
PF: predicated region fallthrough
CT: control target
= control target key end

     0   :  { %s28_s0 = inlined_call_operand.vmem [shape: f32[4], index: 0, kind: input, shape index: {}]   ;;  %s29_s1 = inlined_call_operand.vmem [shape: f32[16,4], index: 1, kind: output, shape index: {}]  }
   0x1   :  { %v4_v0 = vld [vmem:[%s28_s0] ss:$0 sm:$0xff] }
   0x2   :  { %5 = vst [vmem:[%s29_s1] sm:$0xff] %v4_v0  ;;  %8 = vst [vmem:[%s29_s1 + $0x8] sm:$0xff] %v4_v0 }

// kernel: tile.14
= control target key start
LH: loop header
LB: loop body
LE: loop exit
PB: predicated region body
PF: predicated region fallthrough
CT: control target
= control target key end

     0   :  { %s133_s10 = smov 60   ;;  %s134_s11 = smov 52   ;;  %vm3_vm0 = vcmask 31744   ;;  %vm9_vm1 = vcmask 523744   ;;  %vm15_vm2 = vcmask 490944   ;;  %vm21_vm3 = vcmask 458144   ;;  %s209_s0 = inlined_call_operand.vmem [shape: f32[16,4], index: 0, kind: input, shape index: {}]   ;;  %s210_s1 = inlined_call_operand.vmem [shape: f32[1,64], index: 1, kind: output, shape index: {}]  }
   0x1   :  { %v103_v0 = vld [vmem:[%s209_s0 + $0xf] sm:$0x1]   ;;  %v105_v1 = vld [vmem:[%s209_s0 + $0xd] sm:$0x1]   ;;  %v104_v2 = vld [vmem:[%s209_s0 + $0xe] sm:$0x1]  }
   0x2   :  { %7 = vrot.lane.b32.xlu0 %v103_v0, %s133_s10  ;;  %19 = vrot.lane.b32.xlu1 %v105_v1, %s134_s11  ;;  %v106_v3 = vld [vmem:[%s209_s0 + $0xc] sm:$0x1]   ;;  %s135_s16 = smov 56   ;;  %s136_s17 = smov 48   ;;  %v107_v4 = vld [vmem:[%s209_s0 + $0xb] sm:$0x1]  }
   0x3   :  { %v108_v5 = vld [vmem:[%s209_s0 + $0xa] sm:$0x1]   ;;  %v2_v6 = vld [vmem:[%s209_s0] sm:$0x1]   ;;  %s137_s24 = smov 44   ;;  %s138_s25 = smov 40  }
   0x4   :  { %4 = vst.msk [vmem:[#allocation0] sm:$0x1] %vm3_vm0, %v2_v6   ;;  %v109_v7 = vld [vmem:[%s209_s0 + $0x9] sm:$0x1]   ;;  %v110_v8 = vld [vmem:[%s209_s0 + $0x8] sm:$0x1]  }
   0x5   :  { %s139_s30 = smov 36   ;;  %s140_s2 = smov 32   ;;  %v111_v9 = vld [vmem:[%s209_s0 + $0x7] sm:$0x1]   ;;  %v112_v10 = vld [vmem:[%s209_s0 + $0x6] sm:$0x1]  }
   0x6   :  { %13 = vrot.lane.b32.xlu0 %v104_v2, %s135_s16  ;;  %25 = vrot.lane.b32.xlu1 %v106_v3, %s136_s17  ;;  %s141_s7 = smov 28   ;;  %s142_s8 = smov 24   ;;  %v113_v11 = vld [vmem:[%s209_s0 + $0x5] sm:$0x1]   ;;  %v114_v12 = vld [vmem:[%s209_s0 + $0x4] sm:$0x1]  }
   0x7   :  { %s143_s13 = smov 20   ;;  %s144_s14 = smov 16   ;;  %v115_v13 = vld [vmem:[%s209_s0 + $0x3] sm:$0x1]   ;;  %v116_v14 = vld [vmem:[%s209_s0 + $0x2] sm:$0x1]  }
   0x8   :  { %s145_s19 = smov 12   ;;  %s146_s20 = smov 8   ;;  %v117_v15 = vld [vmem:[%s209_s0 + $0x1] sm:$0x1]   ;;  %vm27_vm4 = vcmask 425344   ;;  %vm33_vm5 = vcmask 392544  }
   0x9   :  { %s147_s0 = smov 4   ;;  %vm39_vm6 = vcmask 359744   ;;  %vm45_vm7 = vcmask 326944   ;;  %vm51_vm8 = vcmask 294144   ;;  %vm57_vm9 = vcmask 261344  }
   0xa   :  { %31 = vrot.lane.b32.xlu0 %v107_v4, %s137_s24  ;;  %37 = vrot.lane.b32.xlu1 %v108_v5, %s138_s25  ;;  %vm63_vm10 = vcmask 228544   ;;  %vm69_vm11 = vcmask 195744   ;;  %vm75_vm12 = vcmask 162944   ;;  %vm81_vm13 = vcmask 130144  }
   0xb   :  { %vm87_vm14 = vcmask 97344   ;;  %vm93_vm15 = vcmask 64544  }
   0xe   :  { %43 = vrot.lane.b32.xlu0 %v109_v7, %s139_s30  ;;  %49 = vrot.lane.b32.xlu1 %v110_v8, %s140_s2 }
  0x12   :  { %55 = vrot.lane.b32.xlu0 %v111_v9, %s141_s7  ;;  %61 = vrot.lane.b32.xlu1 %v112_v10, %s142_s8 }
  0x16   :  { %67 = vrot.lane.b32.xlu0 %v113_v11, %s143_s13  ;;  %73 = vrot.lane.b32.xlu1 %v114_v12, %s144_s14 }
  0x1a   :  { %79 = vrot.lane.b32.xlu0 %v115_v13, %s145_s19  ;;  %85 = vrot.lane.b32.xlu1 %v116_v14, %s146_s20 }
  0x1e   :  { %91 = vrot.lane.b32.xlu0 %v117_v15, %s147_s0 }
  0x74   :  { %v8_v16 = vpop.permute.xlu0 %7   ;;  %v20_v17 = vpop.permute.xlu1 %19  }
  0x75   :  { %10 = vst.msk [vmem:[#allocation0] sm:$0x1] %vm9_vm1, %v8_v16  }
  0x78   :  { %v14_v18 = vpop.permute.xlu0 %13   ;;  %v26_v19 = vpop.permute.xlu1 %25  }
  0x79   :  { %16 = vst.msk [vmem:[#allocation0] sm:$0x1] %vm15_vm2, %v14_v18  }
  0x7a   :  { %22 = vst.msk [vmem:[#allocation0] sm:$0x1] %vm21_vm3, %v20_v17  }
  0x7b   :  { %28 = vst.msk [vmem:[#allocation0] sm:$0x1] %vm27_vm4, %v26_v19  }
  0x7c   :  { %v32_v20 = vpop.permute.xlu0 %31   ;;  %v38_v21 = vpop.permute.xlu1 %37  }
  0x7d   :  { %34 = vst.msk [vmem:[#allocation0] sm:$0x1] %vm33_vm5, %v32_v20  }
  0x7e   :  { %40 = vst.msk [vmem:[#allocation0] sm:$0x1] %vm39_vm6, %v38_v21  }
  0x80   :  { %v44_v22 = vpop.permute.xlu0 %43   ;;  %v50_v23 = vpop.permute.xlu1 %49  }
  0x81   :  { %46 = vst.msk [vmem:[#allocation0] sm:$0x1] %vm45_vm7, %v44_v22  }
  0x82   :  { %52 = vst.msk [vmem:[#allocation0] sm:$0x1] %vm51_vm8, %v50_v23  }
  0x84   :  { %v56_v24 = vpop.permute.xlu0 %55   ;;  %v62_v25 = vpop.permute.xlu1 %61  }
  0x85   :  { %58 = vst.msk [vmem:[#allocation0] sm:$0x1] %vm57_vm9, %v56_v24  }
  0x86   :  { %64 = vst.msk [vmem:[#allocation0] sm:$0x1] %vm63_vm10, %v62_v25  }
  0x88   :  { %v68_v26 = vpop.permute.xlu0 %67   ;;  %v74_v27 = vpop.permute.xlu1 %73  }
  0x89   :  { %70 = vst.msk [vmem:[#allocation0] sm:$0x1] %vm69_vm11, %v68_v26  }
  0x8a   :  { %76 = vst.msk [vmem:[#allocation0] sm:$0x1] %vm75_vm12, %v74_v27  }
  0x8c   :  { %v80_v28 = vpop.permute.xlu0 %79   ;;  %v86_v29 = vpop.permute.xlu1 %85  }
  0x8d   :  { %82 = vst.msk [vmem:[#allocation0] sm:$0x1] %vm81_vm13, %v80_v28  }
  0x8e   :  { %88 = vst.msk [vmem:[#allocation0] sm:$0x1] %vm87_vm14, %v86_v29  }
  0x90   :  { %v92_v30 = vpop.permute.xlu0 %91  }
  0x91   :  { %94 = vst.msk [vmem:[#allocation0] sm:$0x1] %vm93_vm15, %v92_v30  }
  0x98   :  { %v99_v31 = vld [vmem:[#allocation0] sm:$0x1] }
  0x99   :  { %102 = vst [vmem:[%s210_s1] sm:$0x1] %v99_v31 }

// kernel: tile.18
= control target key start
LH: loop header
LB: loop body
LE: loop exit
PB: predicated region body
PF: predicated region fallthrough
CT: control target
= control target key end

     0   :  { %s28_s0 = inlined_call_operand.vmem [shape: f32[2], index: 0, kind: input, shape index: {}]   ;;  %s29_s1 = inlined_call_operand.vmem [shape: f32[16,2], index: 1, kind: output, shape index: {}]  }
   0x1   :  { %v4_v0 = vld [vmem:[%s28_s0] ss:$0 sm:$0xff] }
   0x2   :  { %5 = vst [vmem:[%s29_s1] sm:$0xff] %v4_v0  ;;  %8 = vst [vmem:[%s29_s1 + $0x8] sm:$0xff] %v4_v0 }

// kernel: tile.19
= control target key start
LH: loop header
LB: loop body
LE: loop exit
PB: predicated region body
PF: predicated region fallthrough
CT: control target
= control target key end

     0   :  { %s133_s10 = smov 30   ;;  %s134_s11 = smov 26   ;;  %vm3_vm0 = vcmask 15360   ;;  %vm9_vm1 = vcmask 261360   ;;  %vm15_vm2 = vcmask 244960   ;;  %vm21_vm3 = vcmask 228560   ;;  %s209_s0 = inlined_call_operand.vmem [shape: f32[16,2], index: 0, kind: input, shape index: {}]   ;;  %s210_s1 = inlined_call_operand.vmem [shape: f32[1,32], index: 1, kind: output, shape index: {}]  }
   0x1   :  { %v103_v0 = vld [vmem:[%s209_s0 + $0xf] sm:$0x1]   ;;  %v105_v1 = vld [vmem:[%s209_s0 + $0xd] sm:$0x1]   ;;  %v104_v2 = vld [vmem:[%s209_s0 + $0xe] sm:$0x1]  }
   0x2   :  { %7 = vrot.lane.b32.xlu0 %v103_v0, %s133_s10  ;;  %19 = vrot.lane.b32.xlu1 %v105_v1, %s134_s11  ;;  %v106_v3 = vld [vmem:[%s209_s0 + $0xc] sm:$0x1]   ;;  %s135_s16 = smov 28   ;;  %s136_s17 = smov 24   ;;  %v107_v4 = vld [vmem:[%s209_s0 + $0xb] sm:$0x1]  }
   0x3   :  { %v108_v5 = vld [vmem:[%s209_s0 + $0xa] sm:$0x1]   ;;  %v2_v6 = vld [vmem:[%s209_s0] sm:$0x1]   ;;  %s137_s24 = smov 22   ;;  %s138_s25 = smov 20  }
   0x4   :  { %4 = vst.msk [vmem:[#allocation0] sm:$0x1] %vm3_vm0, %v2_v6   ;;  %v109_v7 = vld [vmem:[%s209_s0 + $0x9] sm:$0x1]   ;;  %v110_v8 = vld [vmem:[%s209_s0 + $0x8] sm:$0x1]  }
   0x5   :  { %s139_s30 = smov 18   ;;  %s140_s2 = smov 16   ;;  %v111_v9 = vld [vmem:[%s209_s0 + $0x7] sm:$0x1]   ;;  %v112_v10 = vld [vmem:[%s209_s0 + $0x6] sm:$0x1]  }
   0x6   :  { %13 = vrot.lane.b32.xlu0 %v104_v2, %s135_s16  ;;  %25 = vrot.lane.b32.xlu1 %v106_v3, %s136_s17  ;;  %s141_s7 = smov 14   ;;  %s142_s8 = smov 12   ;;  %v113_v11 = vld [vmem:[%s209_s0 + $0x5] sm:$0x1]   ;;  %v114_v12 = vld [vmem:[%s209_s0 + $0x4] sm:$0x1]  }
   0x7   :  { %s143_s13 = smov 10   ;;  %s144_s14 = smov 8   ;;  %v115_v13 = vld [vmem:[%s209_s0 + $0x3] sm:$0x1]   ;;  %v116_v14 = vld [vmem:[%s209_s0 + $0x2] sm:$0x1]  }
   0x8   :  { %s145_s19 = smov 6   ;;  %s146_s20 = smov 4   ;;  %v117_v15 = vld [vmem:[%s209_s0 + $0x1] sm:$0x1]   ;;  %vm27_vm4 = vcmask 212160   ;;  %vm33_vm5 = vcmask 195760  }
   0x9   :  { %s147_s0 = smov 2   ;;  %vm39_vm6 = vcmask 179360   ;;  %vm45_vm7 = vcmask 162960   ;;  %vm51_vm8 = vcmask 146560   ;;  %vm57_vm9 = vcmask 130160  }
   0xa   :  { %31 = vrot.lane.b32.xlu0 %v107_v4, %s137_s24  ;;  %37 = vrot.lane.b32.xlu1 %v108_v5, %s138_s25  ;;  %vm63_vm10 = vcmask 113760   ;;  %vm69_vm11 = vcmask 97360   ;;  %vm75_vm12 = vcmask 80960   ;;  %vm81_vm13 = vcmask 64560  }
   0xb   :  { %vm87_vm14 = vcmask 48160   ;;  %vm93_vm15 = vcmask 31760  }
   0xe   :  { %43 = vrot.lane.b32.xlu0 %v109_v7, %s139_s30  ;;  %49 = vrot.lane.b32.xlu1 %v110_v8, %s140_s2 }
  0x12   :  { %55 = vrot.lane.b32.xlu0 %v111_v9, %s141_s7  ;;  %61 = vrot.lane.b32.xlu1 %v112_v10, %s142_s8 }
  0x16   :  { %67 = vrot.lane.b32.xlu0 %v113_v11, %s143_s13  ;;  %73 = vrot.lane.b32.xlu1 %v114_v12, %s144_s14 }
  0x1a   :  { %79 = vrot.lane.b32.xlu0 %v115_v13, %s145_s19  ;;  %85 = vrot.lane.b32.xlu1 %v116_v14, %s146_s20 }
  0x1e   :  { %91 = vrot.lane.b32.xlu0 %v117_v15, %s147_s0 }
  0x74   :  { %v8_v16 = vpop.permute.xlu0 %7   ;;  %v20_v17 = vpop.permute.xlu1 %19  }
  0x75   :  { %10 = vst.msk [vmem:[#allocation0] sm:$0x1] %vm9_vm1, %v8_v16  }
  0x78   :  { %v14_v18 = vpop.permute.xlu0 %13   ;;  %v26_v19 = vpop.permute.xlu1 %25  }
  0x79   :  { %16 = vst.msk [vmem:[#allocation0] sm:$0x1] %vm15_vm2, %v14_v18  }
  0x7a   :  { %22 = vst.msk [vmem:[#allocation0] sm:$0x1] %vm21_vm3, %v20_v17  }
  0x7b   :  { %28 = vst.msk [vmem:[#allocation0] sm:$0x1] %vm27_vm4, %v26_v19  }
  0x7c   :  { %v32_v20 = vpop.permute.xlu0 %31   ;;  %v38_v21 = vpop.permute.xlu1 %37  }
  0x7d   :  { %34 = vst.msk [vmem:[#allocation0] sm:$0x1] %vm33_vm5, %v32_v20  }
  0x7e   :  { %40 = vst.msk [vmem:[#allocation0] sm:$0x1] %vm39_vm6, %v38_v21  }
  0x80   :  { %v44_v22 = vpop.permute.xlu0 %43   ;;  %v50_v23 = vpop.permute.xlu1 %49  }
  0x81   :  { %46 = vst.msk [vmem:[#allocation0] sm:$0x1] %vm45_vm7, %v44_v22  }
  0x82   :  { %52 = vst.msk [vmem:[#allocation0] sm:$0x1] %vm51_vm8, %v50_v23  }
  0x84   :  { %v56_v24 = vpop.permute.xlu0 %55   ;;  %v62_v25 = vpop.permute.xlu1 %61  }
  0x85   :  { %58 = vst.msk [vmem:[#allocation0] sm:$0x1] %vm57_vm9, %v56_v24  }
  0x86   :  { %64 = vst.msk [vmem:[#allocation0] sm:$0x1] %vm63_vm10, %v62_v25  }
  0x88   :  { %v68_v26 = vpop.permute.xlu0 %67   ;;  %v74_v27 = vpop.permute.xlu1 %73  }
  0x89   :  { %70 = vst.msk [vmem:[#allocation0] sm:$0x1] %vm69_vm11, %v68_v26  }
  0x8a   :  { %76 = vst.msk [vmem:[#allocation0] sm:$0x1] %vm75_vm12, %v74_v27  }
  0x8c   :  { %v80_v28 = vpop.permute.xlu0 %79   ;;  %v86_v29 = vpop.permute.xlu1 %85  }
  0x8d   :  { %82 = vst.msk [vmem:[#allocation0] sm:$0x1] %vm81_vm13, %v80_v28  }
  0x8e   :  { %88 = vst.msk [vmem:[#allocation0] sm:$0x1] %vm87_vm14, %v86_v29  }
  0x90   :  { %v92_v30 = vpop.permute.xlu0 %91  }
  0x91   :  { %94 = vst.msk [vmem:[#allocation0] sm:$0x1] %vm93_vm15, %v92_v30  }
  0x98   :  { %v99_v31 = vld [vmem:[#allocation0] sm:$0x1] }
  0x99   :  { %102 = vst [vmem:[%s210_s1] sm:$0x1] %v99_v31 }

// kernel: decoder_layer.1
= control target key start
LH: loop header
LB: loop body
LE: loop exit
PB: predicated region body
PF: predicated region fallthrough
CT: control target
= control target key end

     0   :  { %s2142_s17 = smov 0   ;;  %s2724_s0 = inlined_call_operand.vmem [shape: f32[2,18,128], index: 0, kind: input, shape index: {}]   ;;  %s2725_s1 = inlined_call_operand.vmem [shape: f32[2,18,128], index: 1, kind: input, shape index: {}]   ;;  %s2726_s2 = inlined_call_operand.vmem [shape: f32[3,256,80], index: 2, kind: input, shape index: {}]   ;;  %s2727_s3 = inlined_call_operand.vmem [shape: f32[1,64], index: 3, kind: input, shape index: {}]   ;;  %s2728_s4 = inlined_call_operand.vmem [shape: f32[16,64], index: 4, kind: input, shape index: {}]   ;;  %s2729_s5 = inlined_call_operand.vmem [shape: f32[3,128,48], index: 5, kind: input, shape index: {}]   ;;  %s2730_s6 = inlined_call_operand.vmem [shape: f32[1,32], index: 6, kind: input, shape index: {}]   ;;  %s2731_s7 = inlined_call_operand.vmem [shape: f32[16,32], index: 7, kind: input, shape index: {}]   ;;  %s2732_s8 = inlined_call_operand.vmem [shape: f32[2,16,64], index: 8, kind: output, shape index: {0}]   ;;  %s2733_s9 = inlined_call_operand.vmem [shape: f32[2,16,16], index: 9, kind: output, shape index: {1}]   ;;  %s2734_s10 = inlined_call_operand.vmem [shape: f32[2,16,32], index: 10, kind: output, shape index: {2}]   ;;  %s2735_s11 = inlined_call_operand.vmem [shape: f32[2,16,16], index: 11, kind: output, shape index: {3}]  }
   0x1 LB: > { %s1620_s18 = sadd.s32 4294967295, %s2077_s17   ;;  %p1624_p0 = scmp.ge.s32.totalorder %s2077_s17, 1  ;;  %s2077_s17 = sphi %s2142_s17, %s22_s17  }
   0x2   : > { %p354_p1 = scmp.lt.s32.totalorder %s2077_s17, 3 }
   0x4   : > { %p355_p2 = pnand %p1624_p0, %p354_p1 }
   0x5   : > { %p2206_p3 = scmp.lt.s32.totalorder (!%p355_p2), %s1620_s18, 1  ;;  %s2079_s26 = smov (!%p355_p2), 64  }
   0x6   : > { %358 = sbr.rel (%p355_p2) target bundleno = 1301 (0x515), region = 52  ;;  %s2081_s16 = smov (!%p355_p2), 96  }
   0xb   : > { %v1666_v0 = vld [vmem:[%s2726_s2 + $0x1f8] sm:$0xff]  ;;  %v1665_v4 = vld [vmem:[%s2726_s2 + $0x1f0] sm:$0xff]  ;;  %v1664_v8 = vld [vmem:[%s2726_s2 + $0x1e8] sm:$0xff]  ;;  %s2738_s18 = smov (!%p2206_p3, %s1620_s18), 1  ;;  %vm524_vm0 = vcmask 1046528   ;;  %vm722_vm1 = vcmask 1045504  }
   0xc   : > { %v484_v1 = vld [vmem:[%s2726_s2 + $0xf8] sm:$0xff]  ;;  %1745 = vmatprep.subr.mxu0 %v1666_v0  ;;  %v483_v5 = vld [vmem:[%s2726_s2 + $0xf0] sm:$0xff]  ;;  %v482_v9 = vld [vmem:[%s2726_s2 + $0xe8] sm:$0xff]  ;;  %s2051_s20 = smul.u32 24, %s2738_s18  ;;  %s2529_s27 = sshll.u32 %s2738_s18, 4  ;;  %vm834_vm2 = vcmask 130048  }
   0xd   : > { %v1650_v2 = vld [vmem:[%s2726_s2 + $0x178] sm:$0xff]  ;;  %1783 = vmatprep.subr.mxu1 %v484_v1  ;;  %v1649_v6 = vld [vmem:[%s2726_s2 + $0x170] sm:$0xff]  ;;  %v1648_v10 = vld [vmem:[%s2726_s2 + $0x168] sm:$0xff]  ;;  %s428_s15 = scalar_lea.vmem %s2732_s8, %s2529_s27  ;;  %vm931_vm4 = vcmask 523264   ;;  %s438_s28 = scalar_lea.vmem %s2734_s10, %s2529_s27  ;;  %vm1441_vm7 = vcmask 261120  }
   0xe   : > { %v468_v3 = vld [vmem:[%s2726_s2 + $0x78] sm:$0xff]  ;;  %1746 = vmatpush3.msra.mxu0 %v1650_v2  ;;  %v467_v7 = vld [vmem:[%s2726_s2 + $0x70] sm:$0xff]  ;;  %v466_v11 = vld [vmem:[%s2726_s2 + $0x68] sm:$0xff]  ;;  %s2292_s24 = scalar_lea.vmem %s2725_s1, %s2051_s20  ;;  %s2306_s13 = scalar_lea.vmem %s2724_s0, %s2051_s20 }
   0xf   : > { %1784 = vmatpush3.msra.mxu1 %v468_v3  ;;  %1747 = vmatprep.subr.mxu0 %v1665_v4  ;;  %v1663_v12 = vld [vmem:[%s2726_s2 + $0x1e0] sm:$0xff]  ;;  %v1662_v16 = vld [vmem:[%s2726_s2 + $0x1d8] sm:$0xff]  ;;  %v1661_v20 = vld [vmem:[%s2726_s2 + $0x1d0] sm:$0xff] }
  0x10   : > { %1785 = vmatprep.subr.mxu1 %v483_v5  ;;  %1748 = vmatpush3.msra.mxu0 %v1649_v6  ;;  %v481_v13 = vld [vmem:[%s2726_s2 + $0xe0] sm:$0xff]  ;;  %v480_v17 = vld [vmem:[%s2726_s2 + $0xd8] sm:$0xff]  ;;  %v479_v21 = vld [vmem:[%s2726_s2 + $0xd0] sm:$0xff] }
  0x11   : > { %1786 = vmatpush3.msra.mxu1 %v467_v7  ;;  %1749 = vmatprep.subr.mxu0 %v1664_v8  ;;  %v1647_v14 = vld [vmem:[%s2726_s2 + $0x160] sm:$0xff]  ;;  %v1646_v18 = vld [vmem:[%s2726_s2 + $0x158] sm:$0xff]  ;;  %v1645_v22 = vld [vmem:[%s2726_s2 + $0x150] sm:$0xff] }
  0x12   : > { %1787 = vmatprep.subr.mxu1 %v482_v9  ;;  %v465_v15 = vld [vmem:[%s2726_s2 + $0x60] sm:$0xff]  ;;  %1750 = vmatpush3.msra.mxu0 %v1648_v10  ;;  %v464_v19 = vld [vmem:[%s2726_s2 + $0x58] sm:$0xff]  ;;  %v463_v23 = vld [vmem:[%s2726_s2 + $0x50] sm:$0xff] }
  0x13   : > { %1788 = vmatpush3.msra.mxu1 %v466_v11  ;;  %1751 = vmatprep.subr.mxu0 %v1663_v12  ;;  %v1660_v24 = vld [vmem:[%s2726_s2 + $0x1c8] sm:$0xff]  ;;  %v1659_v28 = vld [vmem:[%s2726_s2 + $0x1c0] sm:$0xff]  ;;  %v1658_v32 = vld [vmem:[%s2726_s2 + $0x1b8] sm:$0xff] }
  0x14   : > { %1789 = vmatprep.subr.mxu1 %v481_v13  ;;  %1752 = vmatpush3.msra.mxu0 %v1647_v14  ;;  %v478_v25 = vld [vmem:[%s2726_s2 + $0xc8] sm:$0xff]  ;;  %v477_v29 = vld [vmem:[%s2726_s2 + $0xc0] sm:$0xff]  ;;  %v476_v33 = vld [vmem:[%s2726_s2 + $0xb8] sm:$0xff] }
  0x15   : > { %1790 = vmatpush3.msra.mxu1 %v465_v15  ;;  %1753 = vmatprep.subr.mxu0 %v1662_v16  ;;  %v1644_v26 = vld [vmem:[%s2726_s2 + $0x148] sm:$0xff]  ;;  %v1643_v30 = vld [vmem:[%s2726_s2 + $0x140] sm:$0xff]  ;;  %v1642_v34 = vld [vmem:[%s2726_s2 + $0x138] sm:$0xff] }
  0x16   : > { %1791 = vmatprep.subr.mxu1 %v480_v17  ;;  %1754 = vmatpush3.msra.mxu0 %v1646_v18  ;;  %v462_v27 = vld [vmem:[%s2726_s2 + $0x48] sm:$0xff]  ;;  %v461_v31 = vld [vmem:[%s2726_s2 + $0x40] sm:$0xff]  ;;  %v460_v35 = vld [vmem:[%s2726_s2 + $0x38] sm:$0xff] }
  0x17   : > { %1792 = vmatpush3.msra.mxu1 %v464_v19  ;;  %1755 = vmatprep.subr.mxu0 %v1661_v20  ;;  %v1657_v36 = vld [vmem:[%s2726_s2 + $0x1b0] sm:$0xff]  ;;  %v1656_v40 = vld [vmem:[%s2726_s2 + $0x1a8] sm:$0xff]  ;;  %v1655_v44 = vld [vmem:[%s2726_s2 + $0x1a0] sm:$0xff] }
  0x18   : > { %1793 = vmatprep.subr.mxu1 %v479_v21  ;;  %1756 = vmatpush3.msra.mxu0 %v1645_v22  ;;  %v475_v37 = vld [vmem:[%s2726_s2 + $0xb0] sm:$0xff]  ;;  %v474_v41 = vld [vmem:[%s2726_s2 + $0xa8] sm:$0xff]  ;;  %v473_v45 = vld [vmem:[%s2726_s2 + $0xa0] sm:$0xff] }
  0x19   : > { %1794 = vmatpush3.msra.mxu1 %v463_v23  ;;  %1757 = vmatprep.subr.mxu0 %v1660_v24  ;;  %v1641_v38 = vld [vmem:[%s2726_s2 + $0x130] sm:$0xff]  ;;  %v1640_v42 = vld [vmem:[%s2726_s2 + $0x128] sm:$0xff]  ;;  %v1639_v46 = vld [vmem:[%s2726_s2 + $0x120] sm:$0xff] }
  0x1a   : > { %1795 = vmatprep.subr.mxu1 %v478_v25  ;;  %1758 = vmatpush3.msra.mxu0 %v1644_v26  ;;  %v459_v39 = vld [vmem:[%s2726_s2 + $0x30] sm:$0xff]  ;;  %v458_v43 = vld [vmem:[%s2726_s2 + $0x28] sm:$0xff]  ;;  %v457_v47 = vld [vmem:[%s2726_s2 + $0x20] sm:$0xff] }
  0x1b   : > { %1796 = vmatpush3.msra.mxu1 %v462_v27  ;;  %1759 = vmatprep.subr.mxu0 %v1659_v28  ;;  %v1654_v48 = vld [vmem:[%s2726_s2 + $0x198] sm:$0xff]  ;;  %v2321_v49 = vld [vmem:[%s2292_s24] sm:$0xff]  ;;  %v2324_v50 = vld [vmem:[%s2292_s24 + $0x8] sm:$0xff] }
  0x1c   : > { %1797 = vmatprep.subr.mxu1 %v477_v29  ;;  %1760 = vmatpush3.msra.mxu0 %v1643_v30  ;;  %v472_v51 = vld [vmem:[%s2726_s2 + $0x98] sm:$0xff]  ;;  %v444_v52 = vld [vmem:[%s2306_s13] sm:$0xff]  ;;  %v445_v53 = vld [vmem:[%s2306_s13 + $0x8] sm:$0xff]  ;;  %v528_v62 = vrot.slane %v2321_v49, 1  ;;  %v529_v63 = vrot.slane %v2324_v50, 1  ;;  %v726_v18 = vrot.slane %v2321_v49, 2 }
  0x1d   : > { %1798 = vmatpush3.msra.mxu1 %v461_v31  ;;  %1761 = vmatprep.subr.mxu0 %v1658_v32  ;;  %v1638_v54 = vld [vmem:[%s2726_s2 + $0x118] sm:$0xff]  ;;  %v2338_v56 = vmul.f32 %v2321_v49, %v444_v52  ;;  %v2341_v57 = vmul.f32 %v2324_v50, %v445_v53  ;;  %v1653_v58 = vld [vmem:[%s2726_s2 + $0x190] sm:$0xff]  ;;  %v1652_v0 = vld [vmem:[%s2726_s2 + $0x188] sm:$0xff]  ;;  %v727_v19 = vrot.slane %v2324_v50, 2 }
  0x1e   : > { %1799 = vmatprep.subr.mxu1 %v476_v33  ;;  %1762 = vmatpush3.msra.mxu0 %v1642_v34  ;;  %v456_v55 = vld [vmem:[%s2726_s2 + $0x18] sm:$0xff]  ;;  %v471_v59 = vld [vmem:[%s2726_s2 + $0x90] sm:$0xff]  ;;  %v470_v1 = vld [vmem:[%s2726_s2 + $0x88] sm:$0xff]  ;;  %v530_v9 = vsel %vm524_vm0, %v528_v62, %v529_v63 }
  0x1f   : > { %1800 = vmatpush3.msra.mxu1 %v460_v35  ;;  %1763 = vmatprep.subr.mxu0 %v1657_v36  ;;  %v1637_v60 = vld [vmem:[%s2726_s2 + $0x110] sm:$0xff]  ;;  %v1636_v2 = vld [vmem:[%s2726_s2 + $0x108] sm:$0xff]  ;;  %v525_v4 = vrot.slane %v2338_v56, 1  ;;  %v526_v5 = vrot.slane %v2341_v57, 1  ;;  %v1651_v6 = vld [vmem:[%s2726_s2 + $0x180] sm:$0xff]  ;;  %v728_v27 = vsel %vm722_vm1, %v726_v18, %v727_v19  ;;  %v723_v52 = vrot.slane %v2338_v56, 2 }
  0x20   : > { %1801 = vmatprep.subr.mxu1 %v475_v37  ;;  %1764 = vmatpush3.msra.mxu0 %v1641_v38  ;;  %v455_v61 = vld [vmem:[%s2726_s2 + $0x10] sm:$0xff]  ;;  %v454_v3 = vld [vmem:[%s2726_s2 + $0x8] sm:$0xff]  ;;  %v469_v7 = vld [vmem:[%s2726_s2 + $0x80] sm:$0xff]  ;;  %v724_v53 = vrot.slane %v2341_v57, 2 }
  0x21   : > { %1802 = vmatpush3.msra.mxu1 %v459_v39  ;;  %1765 = vmatprep.subr.mxu0 %v1656_v40  ;;  %v1635_v8 = vld [vmem:[%s2726_s2 + $0x100] sm:$0xff]  ;;  %v527_v11 = vsel %vm524_vm0, %v525_v4, %v526_v5  ;;  %v2386_v12 = vld [vmem:[%s2292_s24 + $0x10] sm:$0x3]  ;;  %v1698_v14 = vld [vmem:[%s2726_s2 + $0x2f8] sm:$0xff]  ;;  %s433_s24 = scalar_lea.vmem %s2733_s9, %s2529_s27 }
  0x22   : > { %1803 = vmatprep.subr.mxu1 %v474_v41  ;;  %1766 = vmatpush3.msra.mxu0 %v1640_v42  ;;  %v453_v10 = vld [vmem:[%s2726_s2] sm:$0xff]  ;;  %v446_v13 = vld [vmem:[%s2306_s13 + $0x10] sm:$0x3]  ;;  %v533_v15 = vrot.slane %v2386_v12, 1  ;;  %v1682_v17 = vld [vmem:[%s2726_s2 + $0x278] sm:$0xff] }
  0x23   : > { %1804 = vmatpush3.msra.mxu1 %v458_v43  ;;  %1767 = vmatprep.subr.mxu0 %v1655_v44  ;;  %v2394_v16 = vmul.f32 %v2386_v12, %v446_v13  ;;  %v1697_v20 = vld [vmem:[%s2726_s2 + $0x2f0] sm:$0xff]  ;;  %v1696_v24 = vld [vmem:[%s2726_s2 + $0x2e8] sm:$0xff]  ;;  %v1695_v28 = vld [vmem:[%s2726_s2 + $0x2e0] sm:$0xff] }
  0x24   : > { %1805 = vmatprep.subr.mxu1 %v473_v45  ;;  %1768 = vmatpush3.msra.mxu0 %v1639_v46  ;;  %v534_v21 = vsel %vm524_vm0, %v529_v63, %v533_v15  ;;  %v1681_v23 = vld [vmem:[%s2726_s2 + $0x270] sm:$0xff]  ;;  %v1680_v26 = vld [vmem:[%s2726_s2 + $0x268] sm:$0xff]  ;;  %v1679_v29 = vld [vmem:[%s2726_s2 + $0x260] sm:$0xff] }
  0x25   : > { %1806 = vmatpush3.msra.mxu1 %v457_v47  ;;  %1769 = vmatprep.subr.mxu0 %v1654_v48  ;;  %v531_v22 = vrot.slane %v2394_v16, 1  ;;  %v1694_v30 = vld [vmem:[%s2726_s2 + $0x2d8] sm:$0xff]  ;;  %v1693_v32 = vld [vmem:[%s2726_s2 + $0x2d0] sm:$0xff]  ;;  %v1692_v34 = vld [vmem:[%s2726_s2 + $0x2c8] sm:$0xff] }
  0x26   : > { %1807 = vmatprep.subr.mxu1 %v472_v51  ;;  %1770 = vmatpush3.msra.mxu0 %v1638_v54  ;;  %v1678_v31 = vld [vmem:[%s2726_s2 + $0x258] sm:$0xff]  ;;  %v1677_v33 = vld [vmem:[%s2726_s2 + $0x250] sm:$0xff]  ;;  %v1676_v35 = vld [vmem:[%s2726_s2 + $0x248] sm:$0xff] }
  0x27   : > { %1808 = vmatpush3.msra.mxu1 %v456_v55  ;;  %1771 = vmatprep.subr.mxu0 %v1653_v58  ;;  %v532_v25 = vsel %vm524_vm0, %v526_v5, %v531_v22  ;;  %v1691_v36 = vld [vmem:[%s2726_s2 + $0x2c0] sm:$0xff]  ;;  %v1690_v38 = vld [vmem:[%s2726_s2 + $0x2b8] sm:$0xff]  ;;  %v1689_v40 = vld [vmem:[%s2726_s2 + $0x2b0] sm:$0xff]  ;;  %v731_v55 = vrot.slane %v2386_v12, 2 }
  0x28   : > { %1809 = vmatprep.subr.mxu1 %v471_v59  ;;  %1772 = vmatpush3.msra.mxu0 %v1637_v60  ;;  %v1675_v37 = vld [vmem:[%s2726_s2 + $0x240] sm:$0xff]  ;;  %v1674_v39 = vld [vmem:[%s2726_s2 + $0x238] sm:$0xff]  ;;  %v1673_v41 = vld [vmem:[%s2726_s2 + $0x230] sm:$0xff] }
  0x29   : > { %1810 = vmatpush3.msra.mxu1 %v455_v61  ;;  %1773 = vmatprep.subr.mxu0 %v1652_v0  ;;  %v1688_v42 = vld [vmem:[%s2726_s2 + $0x2a8] sm:$0xff]  ;;  %v1687_v44 = vld [vmem:[%s2726_s2 + $0x2a0] sm:$0xff]  ;;  %v1686_v46 = vld [vmem:[%s2726_s2 + $0x298] sm:$0xff]  ;;  %v732_v60 = vsel %vm722_vm1, %v727_v19, %v731_v55 }
  0x2a   : > { %1811 = vmatprep.subr.mxu1 %v470_v1  ;;  %1774 = vmatpush3.msra.mxu0 %v1636_v2  ;;  %v1672_v43 = vld [vmem:[%s2726_s2 + $0x228] sm:$0xff]  ;;  %v1671_v45 = vld [vmem:[%s2726_s2 + $0x220] sm:$0xff]  ;;  %v1670_v47 = vld [vmem:[%s2726_s2 + $0x218] sm:$0xff] }
  0x2b   : > { %1812 = vmatpush3.msra.mxu1 %v454_v3  ;;  %1775 = vmatprep.subr.mxu0 %v1651_v6  ;;  %v1685_v48 = vld [vmem:[%s2726_s2 + $0x290] sm:$0xff]  ;;  %v1684_v51 = vld [vmem:[%s2726_s2 + $0x288] sm:$0xff]  ;;  %v1683_v58 = vld [vmem:[%s2726_s2 + $0x280] sm:$0xff] }
  0x2c   : > { %1813 = vmatprep.subr.mxu1 %v469_v7  ;;  %1776 = vmatpush3.msra.mxu0 %v1635_v8  ;;  %v1668_v54 = vld [vmem:[%s2726_s2 + $0x208] sm:$0xff]  ;;  %v1667_v59 = vld [vmem:[%s2726_s2 + $0x200] sm:$0xff]  ;;  %v1711_v55 = vld [vmem:[%s2729_s5 + $0xb8] sm:$0xff] }
  0x2d   : > { %603 = vmatprep.mubr.f32.mxu0 %v530_v9  ;;  %1814 = vmatpush3.msra.mxu1 %v453_v10  ;;  %v827_v9 = vld [vmem:[%s2728_s4 + $0x8] sm:$0xff]  ;;  %v826_v10 = vld [vmem:[%s2728_s4] sm:$0xff] }
  0x2e   : > { %678 = vmatprep.mubr.f32.mxu1 %v2321_v49  ;;  %604 = vmatmul.mubr.f32.vlgmr.msra.gmra.mxu0 %v527_v11  ;;  %v1669_v49 = vld [vmem:[%s2726_s2 + $0x210] sm:$0xff] }
  0x2f   : > { %679 = vmatmul.mubr.f32.vlgmr.msra.gmra.mxu1 %v2338_v56  ;;  %1821 = vmatprep.subr.mxu0 %v1698_v14  ;;  %v725_v56 = vsel %vm722_vm1, %v723_v52, %v724_v53  ;;  %v1053_v52 = vld [vmem:[%s2729_s5 + $0x48] sm:$0xff] }
  0x30   : > { %608 = vmatprep.mubr.f32.mxu0 %v534_v21  ;;  %1822 = vmatpush3.msra.mxu0 %v1682_v17 }
  0x31   : > { %683 = vmatprep.mubr.f32.mxu1 %v2324_v50  ;;  %1823 = vmatprep.subr.mxu0 %v1697_v20 }
  0x32   : > { %1824 = vmatpush3.msra.mxu0 %v1681_v23  ;;  %1925 = vmatprep.subr.mxu1 %v827_v9 }
  0x33   : > { %684 = vmatmul.mubr.f32.gmra.mxu1 %v2341_v57  ;;  %1825 = vmatprep.subr.mxu0 %v1696_v24  ;;  %v729_v57 = vrot.slane %v2394_v16, 2 }
  0x34   : > { %609 = vmatmul.mubr.f32.gmra.mxu0 %v532_v25  ;;  %1926 = vmatpush3.msra.mxu1 %v827_v9 }
  0x35   : > { %1826 = vmatpush3.msra.mxu0 %v1680_v26  ;;  %801 = vmatprep.mubr.f32.mxu0 %v728_v27  ;;  %v730_v61 = vsel %vm722_vm1, %v724_v53, %v729_v57  ;;  %v1712_v53 = vld [vmem:[%s2729_s5 + $0xc0] sm:$0xff]  ;;  %v1709_v57 = vld [vmem:[%s2729_s5 + $0xa8] sm:$0xff] }
  0x36   : > { %1827 = vmatprep.subr.mxu0 %v1695_v28  ;;  %1927 = vmatprep.subr.mxu1 %v826_v10 }
  0x37   : > { %1828 = vmatpush3.msra.mxu0 %v1679_v29  ;;  %1928 = vmatpush3.msra.mxu1 %v826_v10 }
  0x38   : > { %1829 = vmatprep.subr.mxu0 %v1694_v30  ;;  %1932 = vmatprep.subr.mxu1 %v827_v9 }
  0x39   : > { %1830 = vmatpush3.msra.mxu0 %v1678_v31 }
  0x3a   : > { %1831 = vmatprep.subr.mxu0 %v1693_v32 }
  0x3b   : > { %1832 = vmatpush3.msra.mxu0 %v1677_v33 }
  0x3c   : > { %1833 = vmatprep.subr.mxu0 %v1692_v34 }
  0x3d   : > { %1834 = vmatpush3.msra.mxu0 %v1676_v35 }
  0x3e   : > { %1835 = vmatprep.subr.mxu0 %v1691_v36 }
  0x3f   : > { %1836 = vmatpush3.msra.mxu0 %v1675_v37  ;;  %v1719_v37 = vld [vmem:[%s2729_s5 + $0xf8] sm:$0xff] }
  0x40   : > { %1837 = vmatprep.subr.mxu0 %v1690_v38  ;;  %v1059_v38 = vld [vmem:[%s2729_s5 + $0x78] sm:$0xff] }
  0x41   : > { %1838 = vmatpush3.msra.mxu0 %v1674_v39  ;;  %v1718_v39 = vld [vmem:[%s2729_s5 + $0xf0] sm:$0xff] }
  0x42   : > { %1839 = vmatprep.subr.mxu0 %v1689_v40  ;;  %v1058_v40 = vld [vmem:[%s2729_s5 + $0x70] sm:$0xff] }
  0x43   : > { %1840 = vmatpush3.msra.mxu0 %v1673_v41  ;;  %v2080_v41 = vmov 0.0  }
  0x44   : > { %1841 = vmatprep.subr.mxu0 %v1688_v42  ;;  %1038 = vst [vmem:[#allocation2 + $0x8] sm:$0xff] %v2080_v41  ;;  %1039 = vst [vmem:[#allocation2 + $0x10] sm:$0x3] %v2080_v41  ;;  %v1717_v42 = vld [vmem:[%s2729_s5 + $0xe8] sm:$0xff] }
  0x45   : > { %1842 = vmatpush3.msra.mxu0 %v1672_v43  ;;  %1037 = vst [vmem:[#allocation2] sm:$0xff] %v2080_v41  ;;  %v1057_v43 = vld [vmem:[%s2729_s5 + $0x68] sm:$0xff]  ;;  %v1722_v41 = vld [vmem:[%s2729_s5 + $0x110] sm:$0xff] }
  0x46   : > { %1843 = vmatprep.subr.mxu0 %v1687_v44  ;;  %v1716_v44 = vld [vmem:[%s2729_s5 + $0xe0] sm:$0xff] }
  0x47   : > { %1844 = vmatpush3.msra.mxu0 %v1671_v45  ;;  %v1056_v45 = vld [vmem:[%s2729_s5 + $0x60] sm:$0xff] }
  0x48   : > { %1845 = vmatprep.subr.mxu0 %v1686_v46  ;;  %v1715_v46 = vld [vmem:[%s2729_s5 + $0xd8] sm:$0xff] }
  0x49   : > { %1846 = vmatpush3.msra.mxu0 %v1670_v47  ;;  %v1055_v47 = vld [vmem:[%s2729_s5 + $0x58] sm:$0xff] }
  0x4a   : > { %1847 = vmatprep.subr.mxu0 %v1685_v48  ;;  %v1714_v48 = vld [vmem:[%s2729_s5 + $0xd0] sm:$0xff] }
  0x4b   : > { %1848 = vmatpush3.msra.mxu0 %v1669_v49  ;;  %v1054_v49 = vld [vmem:[%s2729_s5 + $0x50] sm:$0xff] }
  0x4c   : > { %1849 = vmatprep.subr.mxu0 %v1684_v51  ;;  %v1713_v51 = vld [vmem:[%s2729_s5 + $0xc8] sm:$0xff] }
  0x4d   : > { %1850 = vmatpush3.msra.mxu0 %v1668_v54  ;;  %v1052_v54 = vld [vmem:[%s2729_s5 + $0x40] sm:$0xff] }
  0x4e   : > { %1851 = vmatprep.subr.mxu0 %v1683_v58  ;;  %v1051_v58 = vld [vmem:[%s2729_s5 + $0x38] sm:$0xff] }
  0x4f   : > { %1852 = vmatpush3.msra.mxu0 %v1667_v59  ;;  %v1710_v59 = vld [vmem:[%s2729_s5 + $0xb0] sm:$0xff] }
  0x50   : > { %802 = vmatmul.mubr.f32.vlgmr.msra.gmra.mxu0 %v725_v56  ;;  %1974 = vmatprep.subr.mxu0 %v1059_v38  ;;  %v1050_v56 = vld [vmem:[%s2729_s5 + $0x30] sm:$0xff] }
  0x51   : > { %806 = vmatprep.mubr.f32.mxu0 %v732_v60  ;;  %1975 = vmatpush3.msra.mxu0 %v1059_v38  ;;  %v1708_v60 = vld [vmem:[%s2729_s5 + $0xa0] sm:$0xff]  ;;  %v1725_v38 = vld [vmem:[%s2729_s5 + $0x128] sm:$0xff] }
  0x52   : > { %1976 = vmatprep.subr.mxu0 %v1058_v40 }
  0x53   : > { %1977 = vmatpush3.msra.mxu0 %v1058_v40  ;;  %v1723_v40 = vld [vmem:[%s2729_s5 + $0x118] sm:$0xff] }
  0x54   : > { %807 = vmatmul.mubr.f32.gmra.mxu0 %v730_v61  ;;  %1978 = vmatprep.subr.mxu0 %v1057_v43  ;;  %v1707_v61 = vld [vmem:[%s2729_s5 + $0x98] sm:$0xff] }
  0x55   : > { %1979 = vmatpush3.msra.mxu0 %v1057_v43  ;;  %v1720_v43 = vld [vmem:[%s2729_s5 + $0x100] sm:$0xff] }
  0x56   : > { %1980 = vmatprep.subr.mxu0 %v1056_v45 }
  0x57   : > { %1981 = vmatpush3.msra.mxu0 %v1056_v45  ;;  %v1338_v45 = vld [vmem:[%s2731_s7 + $0x8] sm:$0xff] }
  0x58   : > { %1982 = vmatprep.subr.mxu0 %v1055_v47 }
  0x59   : > { %1983 = vmatpush3.msra.mxu0 %v1055_v47 }
  0x5a   : > { %1984 = vmatprep.subr.mxu0 %v1054_v49 }
  0x5b   : > { %1985 = vmatpush3.msra.mxu0 %v1054_v49 }
  0x5c   : > { %1986 = vmatprep.subr.mxu0 %v1053_v52 }
  0x5d   : > { %1987 = vmatpush3.msra.mxu0 %v1053_v52 }
  0x5e   : > { %1988 = vmatprep.subr.mxu0 %v1052_v54 }
  0x5f   : > { %1989 = vmatpush3.msra.mxu0 %v1052_v54 }
  0x60   : > { %1990 = vmatprep.subr.mxu0 %v1051_v58 }
  0x61   : > { %1991 = vmatpush3.msra.mxu0 %v1051_v58 }
  0x62   : > { %1992 = vmatprep.subr.mxu0 %v1050_v56 }
  0x63   : > { %1993 = vmatpush3.msra.mxu0 %v1050_v56 }
  0xee   : > { %v1777_v62 = vpop.f32.mrf.mxu0 }
  0xef   : > { %v1815_v63 = vpop.f32.mrf.mxu1 }
  0xf0   : > { %v1778_v0 = vpop.f32.mrf.mxu0 }
  0xf1   : > { %v1816_v1 = vpop.f32.mrf.mxu1  ;;  %v1779_v5 = vadd.f32 %v1778_v0, %v1777_v62  ;;  %v1706_v62 = vld [vmem:[%s2729_s5 + $0x90] sm:$0xff]  ;;  %v1049_v0 = vld [vmem:[%s2729_s5 + $0x28] sm:$0xff] }
  0xf2   : > { %v1817_v6 = vadd.f32 %v1816_v1, %v1815_v63  ;;  %v1705_v63 = vld [vmem:[%s2729_s5 + $0x88] sm:$0xff]  ;;  %1994 = vmatprep.subr.mxu0 %v1049_v0  ;;  %v1704_v1 = vld [vmem:[%s2729_s5 + $0x80] sm:$0xff] }
  0xf3   : > { %v1818_v3 = vpop.f32.mrf.mxu1  ;;  %1995 = vmatpush3.msra.mxu0 %v1049_v0 }
  0xf4   : > { %v1780_v2 = vpop.f32.mrf.mxu0  ;;  %v681_v11 = vadd.f32 %v1817_v6, %v1779_v5  ;;  %v1046_v5 = vld [vmem:[%s2729_s5 + $0x10] sm:$0xff]  ;;  %v1045_v6 = vld [vmem:[%s2729_s5 + $0x8] sm:$0xff] }
  0xf5   : > { %v1819_v7 = vpop.f32.mrf.mxu1 }
  0xf6   : > { %v1781_v4 = vpop.f32.mrf.mxu0  ;;  %v1820_v13 = vadd.f32 %v1819_v7, %v1818_v3  ;;  %v1735_v3 = vld [vmem:[%s2729_s5 + $0x178] sm:$0xff]  ;;  %v1701_v7 = vld [vmem:[%s2727_s3] ss:$0 sm:$0xff] }
  0xf7   : > { %v1782_v12 = vadd.f32 %v1781_v4, %v1780_v2  ;;  %v1048_v2 = vld [vmem:[%s2729_s5 + $0x20] sm:$0xff]  ;;  %v1047_v4 = vld [vmem:[%s2729_s5 + $0x18] sm:$0xff] }
  0xf8   : > { %1996 = vmatprep.subr.mxu0 %v1048_v2 }
  0xf9   : > { %v686_v18 = vadd.f32 %v1820_v13, %v1782_v12  ;;  %1997 = vmatpush3.msra.mxu0 %v1048_v2 }
  0xfa   : > { %1998 = vmatprep.subr.mxu0 %v1047_v4 }
  0xfb   : > { %1999 = vmatpush3.msra.mxu0 %v1047_v4 }
  0xfc   : > { %2000 = vmatprep.subr.mxu0 %v1046_v5 }
  0xfd   : > { %2001 = vmatpush3.msra.mxu0 %v1046_v5 }
  0xfe   : > { %2002 = vmatprep.subr.mxu0 %v1045_v6 }
  0xff   : > { %2003 = vmatpush3.msra.mxu0 %v1045_v6 }
 0x110   : > { %v1853_v8 = vpop.f32.mrf.mxu0 }
 0x112   : > { %v1854_v50 = vpop.f32.mrf.mxu0 }
 0x113   : > { %v1855_v14 = vadd.f32 %v1854_v50, %v1853_v8  ;;  %v1044_v50 = vld [vmem:[%s2729_s5] sm:$0xff] }
 0x114   : > { %v1856_v15 = vpop.f32.mrf.mxu0  ;;  %2004 = vmatprep.subr.mxu0 %v1044_v50 }
 0x115   : > { %v2516_v16 = vadd.f32 %v1855_v14, %v681_v11  ;;  %2005 = vmatpush3.msra.mxu0 %v1044_v50 }
 0x116   : > { %v1857_v17 = vpop.f32.mrf.mxu0  ;;  %2044 = vmatprep.subr.mxu0 %v1338_v45 }
 0x117   : > { %v814_v19 = vadd.f32 1e-08, %v2516_v16  ;;  %v1858_v20 = vadd.f32 %v1857_v17, %v1856_v15  ;;  %v820_v21 = vmax.f32 %v2516_v16, 0.0  ;;  %v921_v11 = vadd.f32 %v1701_v7, %v2516_v16 }
 0x119   : > { %v2520_v22 = vadd.f32 %v1858_v20, %v686_v18  ;;  %v822_v23 = vmin.f32 %v820_v21, 1.0  ;;  %2063 = vrcp.f32 %v814_v19 }
 0x11b   : > { %v815_v24 = vadd.f32 1e-08, %v2520_v22  ;;  %936 = vrot.lane.b32.xlu1 %v822_v23, %s2079_s26  ;;  %v821_v25 = vmax.f32 %v2520_v22, 0.0  ;;  %v922_v8 = vadd.f32 %v1701_v7, %v2520_v22 }
 0x11d   : > { %2065 = vrcp.f32 %v815_v24  ;;  %v823_v26 = vmin.f32 %v821_v25, 1.0 }
 0x11f   : > { %938 = vrot.lane.b32.xlu1 %v823_v26, %s2079_s26 }
 0x126   : > { %v2064_v27 = vpop.eup %2063 }
 0x127   : > { %v817_v28 = vmul.f32 9.0, %v2064_v27  ;;  %v1733_v27 = vld [vmem:[%s2729_s5 + $0x168] sm:$0xff] }
 0x129   : > { %v824_v29 = vmul.f32 %v822_v23, %v817_v28  ;;  %v1732_v28 = vld [vmem:[%s2729_s5 + $0x160] sm:$0xff] }
 0x12a   : > { %v2066_v30 = vpop.eup %2065 }
 0x12b   : > { %830 = vrot.lane.b32.xlu0 %v824_v29, %s2079_s26  ;;  %v819_v31 = vmul.f32 9.0, %v2066_v30  ;;  %v1731_v29 = vld [vmem:[%s2729_s5 + $0x158] sm:$0xff] }
 0x12d   : > { %v825_v32 = vmul.f32 %v823_v26, %v819_v31  ;;  %v1734_v26 = vld [vmem:[%s2729_s5 + $0x170] sm:$0xff] }
 0x12f   : > { %832 = vrot.lane.b32.xlu0 %v825_v32, %s2079_s26 }
 0x18d   : > { %v937_v33 = vpop.permute.xlu1 %936 }
 0x18e   : > { %942 = vst.msk [vmem:[%s433_s24] sm:$0xff] %vm834_vm2, %v937_v33 }
 0x191   : > { %v939_v34 = vpop.permute.xlu1 %938 }
 0x192   : > { %943 = vst.msk [vmem:[%s433_s24 + $0x8] sm:$0xff] %vm834_vm2, %v939_v34 }
 0x19d   : > { %v831_v35 = vpop.permute.xlu0 %830 }
 0x19e   : > { %1929 = vmatprep.mubr.msk.f32.mxu1 %vm834_vm2, %v831_v35  ;;  %v1728_v35 = vld [vmem:[%s2729_s5 + $0x140] sm:$0xff] }
 0x1a1   : > { %v833_v36 = vpop.permute.xlu0 %832 }
 0x1a2   : > { %1930 = vmatmul.mubr.msk.f32.vlgmr.msra.gmra.mxu1 %vm834_vm2, %v833_v36  ;;  %v1727_v36 = vld [vmem:[%s2729_s5 + $0x138] sm:$0xff] }
 0x1a3   : > { %1933 = vmatpush3.msra.mxu1 %v827_v9  ;;  %1936 = vmatprep.mubr.msk.f32.mxu1 %vm834_vm2, %v937_v33  ;;  %v1730_v33 = vld [vmem:[%s2729_s5 + $0x150] sm:$0xff] }
 0x1a4   : > { %1934 = vmatprep.subr.mxu1 %v826_v10 }
 0x1a5   : > { %1935 = vmatpush3.msra.mxu1 %v826_v10 }
 0x1a6   : > { %1937 = vmatmul.mubr.msk.f32.vlgmr.msra.gmra.mxu1 %vm834_vm2, %v939_v34  ;;  %1939 = vmatprep.subr.mxu1 %v1719_v37  ;;  %v1729_v34 = vld [vmem:[%s2729_s5 + $0x148] sm:$0xff] }
 0x1a7   : > { %1940 = vmatpush3.msra.mxu1 %v1719_v37  ;;  %v1726_v37 = vld [vmem:[%s2729_s5 + $0x130] sm:$0xff] }
 0x1a8   : > { %1941 = vmatprep.subr.mxu1 %v1718_v39 }
 0x1a9   : > { %1942 = vmatpush3.msra.mxu1 %v1718_v39  ;;  %v1724_v39 = vld [vmem:[%s2729_s5 + $0x120] sm:$0xff] }
 0x1aa   : > { %1943 = vmatprep.subr.mxu1 %v1717_v42 }
 0x1ab   : > { %1944 = vmatpush3.msra.mxu1 %v1717_v42  ;;  %v1721_v42 = vld [vmem:[%s2729_s5 + $0x108] sm:$0xff] }
 0x1ac   : > { %1945 = vmatprep.subr.mxu1 %v1716_v44 }
 0x1ad   : > { %1946 = vmatpush3.msra.mxu1 %v1716_v44 }
 0x1ae   : > { %1947 = vmatprep.subr.mxu1 %v1715_v46 }
 0x1af   : > { %1948 = vmatpush3.msra.mxu1 %v1715_v46 }
 0x1b0   : > { %1949 = vmatprep.subr.mxu1 %v1714_v48 }
 0x1b1   : > { %1950 = vmatpush3.msra.mxu1 %v1714_v48 }
 0x1b2   : > { %1951 = vmatprep.subr.mxu1 %v1713_v51 }
 0x1b3   : > { %1952 = vmatpush3.msra.mxu1 %v1713_v51 }
 0x1b4   : > { %1953 = vmatprep.subr.mxu1 %v1712_v53 }
 0x1b5   : > { %1954 = vmatpush3.msra.mxu1 %v1712_v53 }
 0x1b6   : > { %1955 = vmatprep.subr.mxu1 %v1711_v55 }
 0x1b7   : > { %1956 = vmatpush3.msra.mxu1 %v1711_v55 }
 0x1b8   : > { %1957 = vmatprep.subr.mxu1 %v1710_v59 }
 0x1b9   : > { %1958 = vmatpush3.msra.mxu1 %v1710_v59 }
 0x1ba   : > { %1959 = vmatprep.subr.mxu1 %v1709_v57 }
 0x1bb   : > { %1960 = vmatpush3.msra.mxu1 %v1709_v57  ;;  %v1337_v57 = vld [vmem:[%s2731_s7] sm:$0xff] }
 0x1bc   : > { %1961 = vmatprep.subr.mxu1 %v1708_v60 }
 0x1bd   : > { %1962 = vmatpush3.msra.mxu1 %v1708_v60 }
 0x1be   : > { %1963 = vmatprep.subr.mxu1 %v1707_v61 }
 0x1bf   : > { %1964 = vmatpush3.msra.mxu1 %v1707_v61 }
 0x1c0   : > { %1965 = vmatprep.subr.mxu1 %v1706_v62 }
 0x1c1   : > { %1966 = vmatpush3.msra.mxu1 %v1706_v62 }
 0x1c2   : > { %1967 = vmatprep.subr.mxu1 %v1705_v63 }
 0x1c3   : > { %1968 = vmatpush3.msra.mxu1 %v1705_v63 }
 0x1c4   : > { %1969 = vmatprep.subr.mxu1 %v1704_v1 }
 0x1c5   : > { %1970 = vmatpush3.msra.mxu1 %v1704_v1 }
 0x1c6   : > { %2009 = vmatprep.subr.mxu1 %v1735_v3 }
 0x262   : > { %v1931_v9 = vpop.f32.mrf.mxu1 }
 0x263   : > { %v924_v10 = vmul.f32 %v1931_v9, %v922_v8  ;;  %v1738_v9 = vld [vmem:[%s2730_s6] ss:$0 sm:$0xff] }
 0x264   : > { %v905_v12 = vpop.f32.mrf.mxu1 }
 0x265   : > { %v928_v13 = vmul.f32 0.2, %v924_v10  ;;  %v923_v14 = vmul.f32 %v921_v11, %v905_v12  ;;  %vm926_vm3 = vcmp.ge.f32.partialorder %v924_v10, 0.0 }
 0x266   : > { %v1938_v15 = vpop.f32.mrf.mxu1 }
 0x267   : > { %v927_v17 = vmul.f32 0.2, %v923_v14  ;;  %v930_v18 = vsel %vm926_vm3, %v924_v10, %v928_v13  ;;  %1031 = vrot.lane.b32.xlu1 %v1938_v15, %s2079_s26  ;;  %vm925_vm5 = vcmp.ge.f32.partialorder %v923_v14, 0.0 }
 0x268   : > { %933 = vst.msk [vmem:[%s428_s15 + $0x8] sm:$0xff] %vm931_vm4, %v930_v18  ;;  %v1026_v16 = vmul.f32 %v1938_v15, %v930_v18  ;;  %v1016_v19 = vpop.f32.mrf.mxu1 }
 0x269   : > { %v929_v20 = vsel %vm925_vm5, %v923_v14, %v927_v17  ;;  %1029 = vrot.lane.b32.xlu0 %v1016_v19, %s2079_s26  ;;  %s443_s26 = scalar_lea.vmem %s2735_s11, %s2529_s27 }
 0x26a   : > { %932 = vst.msk [vmem:[%s428_s15] sm:$0xff] %vm931_vm4, %v929_v20  ;;  %v1025_v22 = vmul.f32 %v1016_v19, %v929_v20 }
 0x2d9   : > { %v1032_v21 = vpop.permute.xlu1 %1031 }
 0x2da   : > { %v1036_v23 = vsel %vm931_vm4, %v1026_v16, %v1032_v21 }
 0x2db   : > { %1041 = vst [vmem:[#allocation2 + $0x9] sm:$0xff] %v1036_v23  ;;  %v1030_v24 = vpop.permute.xlu0 %1029 }
 0x2dc   : > { %v1035_v25 = vsel %vm931_vm4, %v1025_v22, %v1030_v24 }
 0x2dd   : > { %1040 = vst [vmem:[#allocation2 + $0x1] sm:$0xff] %v1035_v25  ;;  %1971 = vmatprep.mubr.f32.mxu1 %v1035_v25 }
 0x2de   : > { %1972 = vmatmul.mubr.f32.vlgmr.msra.gmra.mxu1 %v1036_v23 }
 0x2df   : > { %2010 = vmatpush3.msra.mxu1 %v1735_v3 }
 0x2e0   : > { %2011 = vmatprep.subr.mxu1 %v1734_v26 }
 0x2e1   : > { %2012 = vmatpush3.msra.mxu1 %v1734_v26 }
 0x2e2   : > { %2013 = vmatprep.subr.mxu1 %v1733_v27  ;;  %v1230_v44 = vld [vmem:[#allocation2 + $0xa] sm:$0xff] }
 0x2e3   : > { %2014 = vmatpush3.msra.mxu1 %v1733_v27 }
 0x2e4   : > { %v1042_v30 = vld [vmem:[#allocation2] sm:$0xff]  ;;  %v1043_v31 = vld [vmem:[#allocation2 + $0x8] sm:$0xff]  ;;  %2015 = vmatprep.subr.mxu1 %v1732_v28 }
 0x2e5   : > { %v1229_v32 = vld [vmem:[#allocation2 + $0x2] sm:$0xff]  ;;  %2006 = vmatprep.mubr.f32.mxu0 %v1042_v30  ;;  %2016 = vmatpush3.msra.mxu1 %v1732_v28 }
 0x2e6   : > { %2041 = vmatprep.mubr.f32.mxu1 %v1229_v32  ;;  %2007 = vmatmul.mubr.f32.vlgmr.msra.gmra.mxu0 %v1043_v31 }
 0x2e7   : > { %2017 = vmatprep.subr.mxu1 %v1731_v29  ;;  %2045 = vmatpush3.msra.mxu0 %v1338_v45 }
 0x2e8   : > { %2018 = vmatpush3.msra.mxu1 %v1731_v29  ;;  %2046 = vmatprep.subr.mxu0 %v1337_v57 }
 0x2e9   : > { %2019 = vmatprep.subr.mxu1 %v1730_v33  ;;  %2047 = vmatpush3.msra.mxu0 %v1337_v57 }
 0x2ea   : > { %2020 = vmatpush3.msra.mxu1 %v1730_v33 }
 0x2eb   : > { %2021 = vmatprep.subr.mxu1 %v1729_v34 }
 0x2ec   : > { %2022 = vmatpush3.msra.mxu1 %v1729_v34 }
 0x2ed   : > { %2023 = vmatprep.subr.mxu1 %v1728_v35 }
 0x2ee   : > { %2024 = vmatpush3.msra.mxu1 %v1728_v35 }
 0x2ef   : > { %2025 = vmatprep.subr.mxu1 %v1727_v36 }
 0x2f0   : > { %2026 = vmatpush3.msra.mxu1 %v1727_v36 }
 0x2f1   : > { %2027 = vmatprep.subr.mxu1 %v1726_v37 }
 0x2f2   : > { %2028 = vmatpush3.msra.mxu1 %v1726_v37 }
 0x2f3   : > { %2029 = vmatprep.subr.mxu1 %v1725_v38 }
 0x2f4   : > { %2030 = vmatpush3.msra.mxu1 %v1725_v38 }
 0x2f5   : > { %2031 = vmatprep.subr.mxu1 %v1724_v39 }
 0x2f6   : > { %2032 = vmatpush3.msra.mxu1 %v1724_v39 }
 0x2f7   : > { %2033 = vmatprep.subr.mxu1 %v1723_v40 }
 0x2f8   : > { %2034 = vmatpush3.msra.mxu1 %v1723_v40 }
 0x2f9   : > { %2035 = vmatprep.subr.mxu1 %v1722_v41 }
 0x2fa   : > { %2036 = vmatpush3.msra.mxu1 %v1722_v41 }
 0x2fb   : > { %2037 = vmatprep.subr.mxu1 %v1721_v42 }
 0x2fc   : > { %2038 = vmatpush3.msra.mxu1 %v1721_v42 }
 0x2fd   : > { %2039 = vmatprep.subr.mxu1 %v1720_v43 }
 0x2fe   : > { %2040 = vmatpush3.msra.mxu1 %v1720_v43 }
 0x2ff   : > { %2042 = vmatmul.mubr.f32.vlgmr.msra.gmra.mxu1 %v1230_v44 }
 0x39e   : > { %v1973_v46 = vpop.f32.mrf.mxu1 }
 0x3a0   : > { %v1145_v48 = vpop.f32.mrf.mxu1 }
 0x3a6   : > { %v2008_v47 = vpop.f32.mrf.mxu0 }
 0x3a7   : > { %v1226_v51 = vadd.f32 %v2008_v47, %v1973_v46 }
 0x3a8   : > { %v1220_v49 = vpop.f32.mrf.mxu0 }
 0x3a9   : > { %v1221_v53 = vadd.f32 %v1220_v49, %v1145_v48 }
 0x3bf   : > { %v2043_v52 = vpop.f32.mrf.mxu1 }
 0x3c0   : > { %v1324_v54 = vadd.f32 %v2043_v52, %v1226_v51 }
 0x3c1   : > { %v1314_v55 = vpop.f32.mrf.mxu1 }
 0x3c2   : > { %v1326_v58 = vadd.f32 1e-08, %v1324_v54  ;;  %v1323_v59 = vadd.f32 %v1314_v55, %v1221_v53  ;;  %v1332_v60 = vmax.f32 %v1324_v54, 0.0  ;;  %v1432_v10 = vadd.f32 %v1738_v9, %v1324_v54 }
 0x3c4   : > { %2067 = vrcp.f32 %v1326_v58  ;;  %v1325_v56 = vadd.f32 1e-08, %v1323_v59  ;;  %v1331_v61 = vmax.f32 %v1323_v59, 0.0  ;;  %v1334_v63 = vmin.f32 %v1332_v60, 1.0 }
 0x3c5   : > { %v1431_v13 = vadd.f32 %v1738_v9, %v1323_v59 }
 0x3c6   : > { %2069 = vrcp.f32 %v1325_v56  ;;  %v1333_v2 = vmin.f32 %v1331_v61, 1.0 }
 0x3d1   : > { %v2068_v62 = vpop.eup %2067 }
 0x3d2   : > { %v1330_v0 = vmul.f32 9.0, %v2068_v62 }
 0x3d3   : > { %v2070_v1 = vpop.eup %2069 }
 0x3d4   : > { %v1336_v3 = vmul.f32 %v1334_v63, %v1330_v0  ;;  %v1328_v4 = vmul.f32 9.0, %v2070_v1 }
 0x3d6   : > { %1343 = vrot.lane.b32.xlu1 %v1336_v3, %s2081_s16  ;;  %v1335_v5 = vmul.f32 %v1333_v2, %v1328_v4 }
 0x3d8   : > { %1341 = vrot.lane.b32.xlu0 %v1335_v5, %s2081_s16 }
 0x3da   : > { %1448 = vrot.lane.b32.xlu1 %v1334_v63, %s2081_s16 }
 0x3dc   : > { %1446 = vrot.lane.b32.xlu0 %v1333_v2, %s2081_s16 }
 0x448   : > { %v1344_v6 = vpop.permute.xlu1 %1343 }
 0x44a   : > { %v1342_v7 = vpop.permute.xlu0 %1341 }
 0x44b   : > { %2048 = vmatprep.mubr.msk.f32.mxu0 %vm834_vm2, %v1342_v7 }
 0x44c   : > { %v1449_v8 = vpop.permute.xlu1 %1448  ;;  %2049 = vmatmul.mubr.msk.f32.vlgmr.msra.gmra.mxu0 %vm834_vm2, %v1344_v6 }
 0x44d   : > { %1453 = vst.msk [vmem:[%s443_s26 + $0x8] sm:$0xff] %vm834_vm2, %v1449_v8 }
 0x44e   : > { %v1447_v50 = vpop.permute.xlu0 %1446 }
 0x44f   : > { %1452 = vst.msk [vmem:[%s443_s26] sm:$0xff] %vm834_vm2, %v1447_v50 }
 0x50c   : > { %v2050_v11 = vpop.f32.mrf.mxu0 }
 0x50d   : > { %v1434_v12 = vmul.f32 %v2050_v11, %v1432_v10 }
 0x50e   : > { %v1415_v14 = vpop.f32.mrf.mxu0 }
 0x50f   : > { %vm1436_vm6 = vcmp.ge.f32.partialorder %v1434_v12, 0.0  ;;  %v1438_v15 = vmul.f32 0.2, %v1434_v12  ;;  %v1433_v17 = vmul.f32 %v1431_v13, %v1415_v14 }
 0x511   : > { %v1440_v18 = vsel %vm1436_vm6, %v1434_v12, %v1438_v15  ;;  %vm1435_vm8 = vcmp.ge.f32.partialorder %v1433_v17, 0.0  ;;  %v1437_v16 = vmul.f32 0.2, %v1433_v17 }
 0x512   : > { %1443 = vst.msk [vmem:[%s438_s28 + $0x8] sm:$0xff] %vm1441_vm7, %v1440_v18 }
 0x513   : > { %v1439_v19 = vsel %vm1435_vm8, %v1433_v17, %v1437_v16 }
 0x514   : > { %1442 = vst.msk [vmem:[%s438_s28] sm:$0xff] %vm1441_vm7, %v1439_v19 }
 0x515 PF: > { %s22_s17 = sadd.s32 1, %s2077_s17  }
 0x516   : > { %p19_p4 = scmp.ge.s32.totalorder %s22_s17, 4  }
 0x518   :  { %21 = sbr.rel (!%p19_p4) target bundleno = 1 (0x1), region = 125 }

</bundles_post_ra>
